<compile_context>
chip_gen: v5e
topology: v5e:2x2
jax: 0.10.0
libtpu: 0.0.40
codegen_flags: <defaults>
</compile_context>

<pallas_src>
import jax
import jax.numpy as jnp
from jax import lax
from jax.experimental import pallas as pl
from jax.experimental.pallas import tpu as pltpu  # noqa: F401  (kept for TPU-specific extensions)

# ---------------- model config (small, consistent with the module) -------------
BATCH = 2
CHANNELS = 3
IMAGE = 16
PATCH = 8
EMBED = 32
NUM_HEADS = 4
HEAD_DIM = EMBED // NUM_HEADS
INTERMEDIATE = 64
NUM_LAYERS = 2
LN_EPS = 1e-5

NUM_PATCHES = (IMAGE // PATCH) ** 2          # 4
SEQ = NUM_PATCHES + 1                        # 5 (cls + patches)
PATCH_DIM = CHANNELS * PATCH * PATCH         # 192


# ------------------------------ fused Pallas kernel -----------------------------
def _encoder_kernel(patches_ref, conv_w_ref, bias_pos_ref,
                    ln1g_ref, ln1b_ref, qkv_w_ref, qkv_b_ref,
                    pw_ref, pb_ref, ln2g_ref, ln2b_ref,
                    f1w_ref, f1b_ref, f2w_ref, f2b_ref, out_ref):
    """Whole BLIP-2 vision encoder (all images, all layers) in one invocation."""
    n_rows = patches_ref.shape[0]
    n_imgs = n_rows // SEQ

    def mm(a_bf16, b_bf16):
        # bf16 MXU inputs, f32 accumulation.
        return lax.dot_general(a_bf16, b_bf16, (((1,), (0,)), ((), ())),
                               preferred_element_type=jnp.float32)

    def layernorm(x, g, b):
        mean = jnp.mean(x, axis=-1, keepdims=True)
        var = jnp.mean(jnp.square(x - mean), axis=-1, keepdims=True)
        return (x - mean) * lax.rsqrt(var + LN_EPS) * g + b

    # --- embeddings ------------------------------------------------------------
    # Row b*SEQ of `patches` is all-zero; bias_pos already carries cls+pos[0]
    # there and conv_b+pos[r] elsewhere, so no in-kernel splice is needed.
    hidden = mm(patches_ref[...].astype(jnp.bfloat16), conv_w_ref[...]) + bias_pos_ref[...]

    scale = float(HEAD_DIM) ** -0.5
    for l in range(NUM_LAYERS):
        # --- self-attention block (pre-LN) ---
        residual = hidden
        x = layernorm(hidden, ln1g_ref[l], ln1b_ref[l]).astype(jnp.bfloat16)
        qkv = mm(x, qkv_w_ref[l]) + qkv_b_ref[l]              # [rows, 3E] f32

        ctx_imgs = []
        for b in range(n_imgs):                               # block-diagonal attention per image
            r0 = b * SEQ
            head_ctx = []
            for h in range(NUM_HEADS):
                c0 = h * HEAD_DIM
                q = qkv[r0:r0 + SEQ, c0:c0 + HEAD_DIM].astype(jnp.bfloat16)
                k = qkv[r0:r0 + SEQ, EMBED + c0:EMBED + c0 + HEAD_DIM].astype(jnp.bfloat16)
                v = qkv[r0:r0 + SEQ, 2 * EMBED + c0:2 * EMBED + c0 + HEAD_DIM].astype(jnp.bfloat16)
                # contract last dims of q and k -> no k.T materialization
                s = lax.dot_general(q, k, (((1,), (1,)), ((), ())),
                                    preferred_element_type=jnp.float32) * scale
                s = s - jnp.max(s, axis=-1, keepdims=True)
                p = jnp.exp(s)
                p = p * pl.reciprocal(jnp.sum(p, axis=-1, keepdims=True), approx=True)
                head_ctx.append(mm(p.astype(jnp.bfloat16), v))     # [SEQ, Dh] f32
            ctx_imgs.append(jnp.concatenate(head_ctx, axis=-1))    # [SEQ, E]
        ctx_all = jnp.concatenate(ctx_imgs, axis=0).astype(jnp.bfloat16)   # [rows, E]
        hidden = residual + mm(ctx_all, pw_ref[l]) + pb_ref[l]

        # --- MLP block (pre-LN) ---
        residual = hidden
        x = layernorm(hidden, ln2g_ref[l], ln2b_ref[l]).astype(jnp.bfloat16)
        # TODO(synk): HF BLIP-2 uses exact erf-GELU; tanh approximation used for
        # guaranteed Mosaic lowering (max abs deviation ~1e-3).
        h1 = jax.nn.gelu(mm(x, f1w_ref[l]) + f1b_ref[l], approximate=True)
        hidden = residual + mm(h1.astype(jnp.bfloat16), f2w_ref[l]) + f2b_ref[l]

    out_ref[...] = hidden.astype(out_ref.dtype)


# ------------------------- vision model forward (glue) --------------------------
def _blip2_vision_forward(pixel_values, kp):
    """Blip2VisionModel encoder; returns hidden_states[-1] (pre post-layernorm)."""
    B, C, H, W = pixel_values.shape
    nh, nw = H // PATCH, W // PATCH

    # Conv2d(C, E, kernel=p, stride=p) == patchify + matmul (matmul is in-kernel).
    patches = pixel_values.reshape(B, C, nh, PATCH, nw, PATCH)
    patches = patches.transpose(0, 2, 4, 1, 3, 5).reshape(B, nh * nw, PATCH_DIM)
    # Prepend a zero row per image (CLS slot) and stack the batch on the row axis
    # so the whole batch is processed in a single grid-less kernel invocation.
    patches = jnp.pad(patches, ((0, 0), (1, 0), (0, 0))).reshape(B * SEQ, PATCH_DIM)
    bias_pos = jnp.tile(kp["bias_pos"], (B, 1))                        # [B*SEQ, E]

    out = pl.pallas_call(
        _encoder_kernel,
        out_shape=jax.ShapeDtypeStruct((B * SEQ, EMBED), jnp.float32),
        # no grid: every operand is a whole-array VMEM block; no pipelining,
        # no double-buffered weight copies.
    )(patches, kp["conv_w"], bias_pos,
      kp["ln1_g"], kp["ln1_b"], kp["qkv_w"], kp["qkv_b"],
      kp["proj_w"], kp["proj_b"], kp["ln2_g"], kp["ln2_b"],
      kp["fc1_w"], kp["fc1_b"], kp["fc2_w"], kp["fc2_b"])
    return out.reshape(B, SEQ, EMBED)


blip2_vision_forward = jax.jit(_blip2_vision_forward)


def blip2_vision_tower_forward(pixel_values, kparams, num_images):
    """Mirrors Blip2VisionTower.forward.

    The reference recomputes an identical vision_model forward for every image
    in the list; here the encoder runs once and the (identical) result is reused
    (pure perf win, same semantics).
    """
    last_hidden = blip2_vision_forward(pixel_values, kparams)
    img_feats = last_hidden[1:, :, :]   # dim-0 slice, exactly as the reference code
    image_features = []
    captions = []
    for _ in range(num_images):
        image_features.append(img_feats)
        # TODO(synk): caption generation (Blip2ForConditionalGeneration.generate +
        # tokenizer batch_decode) has no Pallas equivalent.
        image_features.append(img_feats)   # reference appends the same features twice
    return image_features, captions


# ----------------------------- deterministic params -----------------------------
def init_params(key):
    def nrm(k, shape, scale=0.02):
        return scale * jax.random.normal(k, shape, dtype=jnp.float32)

    keys = iter(jax.random.split(key, 8 + NUM_LAYERS * 8))
    params = {
        "patch_w": nrm(next(keys), (EMBED, CHANNELS, PATCH, PATCH)),
        "patch_b": nrm(next(keys), (EMBED,)),
        "class_emb": nrm(next(keys), (1, 1, EMBED)),
        "pos_emb": nrm(next(keys), (1, SEQ, EMBED)),
        "layers": [],
    }
    for _ in range(NUM_LAYERS):
        q_bias = nrm(next(keys), (EMBED,))
        v_bias = nrm(next(keys), (EMBED,))
        # HF Blip2Attention: qkv bias = concat(q_bias, zeros(k), v_bias)
        qkv_b = jnp.concatenate([q_bias, jnp.zeros((EMBED,), jnp.float32), v_bias])
        layer = {
            "ln1_g": jnp.ones((EMBED,), jnp.float32),
            "ln1_b": jnp.zeros((EMBED,), jnp.float32),
            "qkv_w": nrm(next(keys), (EMBED, 3 * EMBED)),      # [E, 3E] (in, out)
            "qkv_b": qkv_b,
            "proj_w": nrm(next(keys), (EMBED, EMBED)),         # [E, E]  (in, out)
            "proj_b": nrm(next(keys), (EMBED,)),
            "ln2_g": jnp.ones((EMBED,), jnp.float32),
            "ln2_b": jnp.zeros((EMBED,), jnp.float32),
            "fc1_w": nrm(next(keys), (EMBED, INTERMEDIATE)),   # [E, I]
            "fc1_b": nrm(next(keys), (INTERMEDIATE,)),
            "fc2_w": nrm(next(keys), (INTERMEDIATE, EMBED)),   # [I, E]
            "fc2_b": nrm(next(keys), (EMBED,)),
        }
        params["layers"].append(layer)
    return params


def prepare_kernel_params(params):
    """One-time repack of the standard param layout into the fused-kernel layout:
    lane-dense fused QKV / proj weights, layer-stacked tensors, bf16 MXU weights,
    and a combined conv-bias + positional-embedding + CLS-splice tensor."""
    L, E, I = NUM_LAYERS, EMBED, INTERMEDIATE

    def stack(name):
        return jnp.stack([layer[name] for layer in params["layers"]])

    pos = params["pos_emb"].reshape(SEQ, E)
    conv_b = params["patch_b"].reshape(1, E)
    cls = params["class_emb"].reshape(1, E)
    # Row 0 of the padded patch slab is all-zero, so folding (cls + pos[0]) into
    # row 0 here reproduces the CLS-token splice with zero in-kernel cost.
    bias_pos = pos + conv_b
    bias_pos = bias_pos.at[0].set(cls[0] + pos[0])

    kp = {
        "conv_w": params["patch_w"].reshape(E, PATCH_DIM).T.astype(jnp.bfloat16),  # [PD, E]
        "bias_pos": bias_pos,                                   # [SEQ, E] f32
        "ln1_g": stack("ln1_g").reshape(L, 1, E),
        "ln1_b": stack("ln1_b").reshape(L, 1, E),
        "qkv_w": stack("qkv_w").astype(jnp.bfloat16),           # [L, E, 3E] lane-dense
        "qkv_b": stack("qkv_b").reshape(L, 1, 3 * E),
        "proj_w": stack("proj_w").astype(jnp.bfloat16),         # [L, E, E]
        "proj_b": stack("proj_b").reshape(L, 1, E),
        "ln2_g": stack("ln2_g").reshape(L, 1, E),
        "ln2_b": stack("ln2_b").reshape(L, 1, E),
        "fc1_w": stack("fc1_w").astype(jnp.bfloat16),           # [L, E, I]
        "fc1_b": stack("fc1_b").reshape(L, 1, I),
        "fc2_w": stack("fc2_w").astype(jnp.bfloat16),           # [L, I, E]
        "fc2_b": stack("fc2_b").reshape(L, 1, E),
    }
    return kp


if __name__ == "__main__":
    key = jax.random.PRNGKey(0)
    k_params, k_x = jax.random.split(key)
    params = init_params(k_params)
    kparams = prepare_kernel_params(params)

    # "processed" pixel values for a batch of 2 images, NCHW like PyTorch.
    pixel_values = jax.random.normal(k_x, (BATCH, CHANNELS, IMAGE, IMAGE), dtype=jnp.float32)

    image_features, captions = blip2_vision_tower_forward(pixel_values, kparams, num_images=BATCH)
    for feats in image_features:
        jax.block_until_ready(feats)

    assert len(image_features) == 2 * BATCH
    assert image_features[0].shape == (BATCH - 1, SEQ, EMBED)
    assert bool(jnp.all(jnp.isfinite(image_features[0])))
    print("KERNEL_OK")
</pallas_src>

<mosaic_0001>
module attributes {stable_mosaic.version = 11 : i64} {
  func.func @_encoder_kernel(%arg0: memref<10x192xf32, #tpu.memory_space<vmem>>, %arg1: memref<192x32xbf16, #tpu.memory_space<vmem>>, %arg2: memref<10x32xf32, #tpu.memory_space<vmem>>, %arg3: memref<2x1x32xf32, #tpu.memory_space<vmem>>, %arg4: memref<2x1x32xf32, #tpu.memory_space<vmem>>, %arg5: memref<2x32x96xbf16, #tpu.memory_space<vmem>>, %arg6: memref<2x1x96xf32, #tpu.memory_space<vmem>>, %arg7: memref<2x32x32xbf16, #tpu.memory_space<vmem>>, %arg8: memref<2x1x32xf32, #tpu.memory_space<vmem>>, %arg9: memref<2x1x32xf32, #tpu.memory_space<vmem>>, %arg10: memref<2x1x32xf32, #tpu.memory_space<vmem>>, %arg11: memref<2x32x64xbf16, #tpu.memory_space<vmem>>, %arg12: memref<2x1x64xf32, #tpu.memory_space<vmem>>, %arg13: memref<2x64x32xbf16, #tpu.memory_space<vmem>>, %arg14: memref<2x1x32xf32, #tpu.memory_space<vmem>>, %arg15: memref<10x32xf32, #tpu.memory_space<vmem>>) attributes {dimension_semantics = [], scalar_prefetch = 0 : i64, scratch_operands = 0 : i64, tpu.core_type = #tpu.core_type<tc>} {
    %c0 = arith.constant 0 : index
    %c0_0 = arith.constant 0 : index
    %0 = vector.load %arg0[%c0, %c0_0] : memref<10x192xf32, #tpu.memory_space<vmem>>, vector<10x192xf32>
    %1 = arith.truncf %0 : vector<10x192xf32> to vector<10x192xbf16>
    %c0_1 = arith.constant 0 : index
    %c0_2 = arith.constant 0 : index
    %2 = vector.load %arg1[%c0_1, %c0_2] : memref<192x32xbf16, #tpu.memory_space<vmem>>, vector<192x32xbf16>
    %cst = arith.constant dense<0.000000e+00> : vector<10x32xf32>
    %3 = tpu.matmul %1, %2, %cst {dimension_numbers = #tpu.dot_dimension_numbers<[1], [0], [0], [1], [0, 0, 1, 1], [], []>} : vector<10x192xbf16>, vector<192x32xbf16>, vector<10x32xf32> -> vector<10x32xf32>
    %c0_3 = arith.constant 0 : index
    %c0_4 = arith.constant 0 : index
    %4 = vector.load %arg2[%c0_3, %c0_4] : memref<10x32xf32, #tpu.memory_space<vmem>>, vector<10x32xf32>
    %5 = arith.addf %3, %4 : vector<10x32xf32>
    %c0_5 = arith.constant 0 : index
    %c0_6 = arith.constant 0 : index
    %c0_7 = arith.constant 0 : index
    %6 = vector.load %arg3[%c0_5, %c0_6, %c0_7] : memref<2x1x32xf32, #tpu.memory_space<vmem>>, vector<1x1x32xf32>
    %7 = vector.shape_cast %6 : vector<1x1x32xf32> to vector<1x32xf32>
    %c0_8 = arith.constant 0 : index
    %c0_9 = arith.constant 0 : index
    %c0_10 = arith.constant 0 : index
    %8 = vector.load %arg4[%c0_8, %c0_9, %c0_10] : memref<2x1x32xf32, #tpu.memory_space<vmem>>, vector<1x1x32xf32>
    %9 = vector.shape_cast %8 : vector<1x1x32xf32> to vector<1x32xf32>
    %cst_11 = arith.constant dense<0.000000e+00> : vector<10xf32>
    %10 = vector.multi_reduction <add>, %5, %cst_11 [1] : vector<10x32xf32> to vector<10xf32>
    %11 = vector.shape_cast %10 : vector<10xf32> to vector<10x1xf32>
    %cst_12 = arith.constant 3.200000e+01 : f32
    %12 = vector.broadcast %cst_12 : f32 to vector<10x1xf32>
    %13 = arith.divf %11, %12 : vector<10x1xf32>
    %14 = vector.broadcast %13 : vector<10x1xf32> to vector<10x32xf32>
    %15 = arith.subf %5, %14 : vector<10x32xf32>
    %16 = arith.mulf %15, %15 : vector<10x32xf32>
    %cst_13 = arith.constant dense<0.000000e+00> : vector<10xf32>
    %17 = vector.multi_reduction <add>, %16, %cst_13 [1] : vector<10x32xf32> to vector<10xf32>
    %18 = vector.shape_cast %17 : vector<10xf32> to vector<10x1xf32>
    %cst_14 = arith.constant 3.200000e+01 : f32
    %19 = vector.broadcast %cst_14 : f32 to vector<10x1xf32>
    %20 = arith.divf %18, %19 : vector<10x1xf32>
    %21 = vector.broadcast %13 : vector<10x1xf32> to vector<10x32xf32>
    %22 = arith.subf %5, %21 : vector<10x32xf32>
    %cst_15 = arith.constant 9.99999974E-6 : f32
    %23 = vector.broadcast %cst_15 : f32 to vector<10x1xf32>
    %24 = arith.addf %20, %23 : vector<10x1xf32>
    %25 = math.rsqrt %24 : vector<10x1xf32>
    %26 = vector.broadcast %25 : vector<10x1xf32> to vector<10x32xf32>
    %27 = arith.mulf %22, %26 : vector<10x32xf32>
    %28 = vector.broadcast %7 : vector<1x32xf32> to vector<10x32xf32>
    %29 = arith.mulf %27, %28 : vector<10x32xf32>
    %30 = vector.broadcast %9 : vector<1x32xf32> to vector<10x32xf32>
    %31 = arith.addf %29, %30 : vector<10x32xf32>
    %32 = arith.truncf %31 : vector<10x32xf32> to vector<10x32xbf16>
    %c0_16 = arith.constant 0 : index
    %c0_17 = arith.constant 0 : index
    %c0_18 = arith.constant 0 : index
    %33 = vector.load %arg5[%c0_16, %c0_17, %c0_18] : memref<2x32x96xbf16, #tpu.memory_space<vmem>>, vector<1x32x96xbf16>
    %34 = vector.shape_cast %33 : vector<1x32x96xbf16> to vector<32x96xbf16>
    %cst_19 = arith.constant dense<0.000000e+00> : vector<10x96xf32>
    %35 = tpu.matmul %32, %34, %cst_19 {dimension_numbers = #tpu.dot_dimension_numbers<[1], [0], [0], [1], [0, 0, 1, 1], [], []>} : vector<10x32xbf16>, vector<32x96xbf16>, vector<10x96xf32> -> vector<10x96xf32>
    %c0_20 = arith.constant 0 : index
    %c0_21 = arith.constant 0 : index
    %c0_22 = arith.constant 0 : index
    %36 = vector.load %arg6[%c0_20, %c0_21, %c0_22] : memref<2x1x96xf32, #tpu.memory_space<vmem>>, vector<1x1x96xf32>
    %37 = vector.shape_cast %36 : vector<1x1x96xf32> to vector<1x96xf32>
    %38 = vector.broadcast %37 : vector<1x96xf32> to vector<10x96xf32>
    %39 = arith.addf %35, %38 : vector<10x96xf32>
    %40 = vector.extract_strided_slice %39 {offsets = [0, 0], sizes = [5, 8], strides = [1, 1]} : vector<10x96xf32> to vector<5x8xf32>
    %41 = arith.truncf %40 : vector<5x8xf32> to vector<5x8xbf16>
    %42 = vector.extract_strided_slice %39 {offsets = [0, 32], sizes = [5, 8], strides = [1, 1]} : vector<10x96xf32> to vector<5x8xf32>
    %43 = arith.truncf %42 : vector<5x8xf32> to vector<5x8xbf16>
    %44 = vector.extract_strided_slice %39 {offsets = [0, 64], sizes = [5, 8], strides = [1, 1]} : vector<10x96xf32> to vector<5x8xf32>
    %45 = arith.truncf %44 : vector<5x8xf32> to vector<5x8xbf16>
    %cst_23 = arith.constant dense<0.000000e+00> : vector<5x5xf32>
    %46 = tpu.matmul %41, %43, %cst_23 {dimension_numbers = #tpu.dot_dimension_numbers<[1], [1], [0], [0], [0, 0, 1, 0], [], []>} : vector<5x8xbf16>, vector<5x8xbf16>, vector<5x5xf32> -> vector<5x5xf32>
    %cst_24 = arith.constant 0.353553385 : f32
    %47 = vector.broadcast %cst_24 : f32 to vector<5x5xf32>
    %48 = arith.mulf %46, %47 : vector<5x5xf32>
    %cst_25 = arith.constant dense<0xFF800000> : vector<5xf32>
    %49 = vector.multi_reduction <maximumf>, %48, %cst_25 [1] : vector<5x5xf32> to vector<5xf32>
    %50 = vector.shape_cast %49 : vector<5xf32> to vector<5x1xf32>
    %51 = vector.broadcast %50 : vector<5x1xf32> to vector<5x5xf32>
    %52 = arith.subf %48, %51 : vector<5x5xf32>
    %53 = math.exp %52 : vector<5x5xf32>
    %cst_26 = arith.constant dense<0.000000e+00> : vector<5xf32>
    %54 = vector.multi_reduction <add>, %53, %cst_26 [1] : vector<5x5xf32> to vector<5xf32>
    %55 = vector.shape_cast %54 : vector<5xf32> to vector<5x1xf32>
    %56 = tpu.reciprocal %55 {approx = true} : vector<5x1xf32> -> vector<5x1xf32>
    %57 = vector.broadcast %56 : vector<5x1xf32> to vector<5x5xf32>
    %58 = arith.mulf %53, %57 : vector<5x5xf32>
    %59 = arith.truncf %58 : vector<5x5xf32> to vector<5x5xbf16>
    %cst_27 = arith.constant dense<0.000000e+00> : vector<5x8xf32>
    %60 = tpu.matmul %59, %45, %cst_27 {dimension_numbers = #tpu.dot_dimension_numbers<[1], [0], [0], [1], [0, 0, 1, 1], [], []>} : vector<5x5xbf16>, vector<5x8xbf16>, vector<5x8xf32> -> vector<5x8xf32>
    %61 = vector.extract_strided_slice %39 {offsets = [0, 8], sizes = [5, 8], strides = [1, 1]} : vector<10x96xf32> to vector<5x8xf32>
    %62 = arith.truncf %61 : vector<5x8xf32> to vector<5x8xbf16>
    %63 = vector.extract_strided_slice %39 {offsets = [0, 40], sizes = [5, 8], strides = [1, 1]} : vector<10x96xf32> to vector<5x8xf32>
    %64 = arith.truncf %63 : vector<5x8xf32> to vector<5x8xbf16>
    %65 = vector.extract_strided_slice %39 {offsets = [0, 72], sizes = [5, 8], strides = [1, 1]} : vector<10x96xf32> to vector<5x8xf32>
    %66 = arith.truncf %65 : vector<5x8xf32> to vector<5x8xbf16>
    %cst_28 = arith.constant dense<0.000000e+00> : vector<5x5xf32>
    %67 = tpu.matmul %62, %64, %cst_28 {dimension_numbers = #tpu.dot_dimension_numbers<[1], [1], [0], [0], [0, 0, 1, 0], [], []>} : vector<5x8xbf16>, vector<5x8xbf16>, vector<5x5xf32> -> vector<5x5xf32>
    %cst_29 = arith.constant 0.353553385 : f32
    %68 = vector.broadcast %cst_29 : f32 to vector<5x5xf32>
    %69 = arith.mulf %67, %68 : vector<5x5xf32>
    %cst_30 = arith.constant dense<0xFF800000> : vector<5xf32>
    %70 = vector.multi_reduction <maximumf>, %69, %cst_30 [1] : vector<5x5xf32> to vector<5xf32>
    %71 = vector.shape_cast %70 : vector<5xf32> to vector<5x1xf32>
    %72 = vector.broadcast %71 : vector<5x1xf32> to vector<5x5xf32>
    %73 = arith.subf %69, %72 : vector<5x5xf32>
    %74 = math.exp %73 : vector<5x5xf32>
    %cst_31 = arith.constant dense<0.000000e+00> : vector<5xf32>
    %75 = vector.multi_reduction <add>, %74, %cst_31 [1] : vector<5x5xf32> to vector<5xf32>
    %76 = vector.shape_cast %75 : vector<5xf32> to vector<5x1xf32>
    %77 = tpu.reciprocal %76 {approx = true} : vector<5x1xf32> -> vector<5x1xf32>
    %78 = vector.broadcast %77 : vector<5x1xf32> to vector<5x5xf32>
    %79 = arith.mulf %74, %78 : vector<5x5xf32>
    %80 = arith.truncf %79 : vector<5x5xf32> to vector<5x5xbf16>
    %cst_32 = arith.constant dense<0.000000e+00> : vector<5x8xf32>
    %81 = tpu.matmul %80, %66, %cst_32 {dimension_numbers = #tpu.dot_dimension_numbers<[1], [0], [0], [1], [0, 0, 1, 1], [], []>} : vector<5x5xbf16>, vector<5x8xbf16>, vector<5x8xf32> -> vector<5x8xf32>
    %82 = vector.extract_strided_slice %39 {offsets = [0, 16], sizes = [5, 8], strides = [1, 1]} : vector<10x96xf32> to vector<5x8xf32>
    %83 = arith.truncf %82 : vector<5x8xf32> to vector<5x8xbf16>
    %84 = vector.extract_strided_slice %39 {offsets = [0, 48], sizes = [5, 8], strides = [1, 1]} : vector<10x96xf32> to vector<5x8xf32>
    %85 = arith.truncf %84 : vector<5x8xf32> to vector<5x8xbf16>
    %86 = vector.extract_strided_slice %39 {offsets = [0, 80], sizes = [5, 8], strides = [1, 1]} : vector<10x96xf32> to vector<5x8xf32>
    %87 = arith.truncf %86 : vector<5x8xf32> to vector<5x8xbf16>
    %cst_33 = arith.constant dense<0.000000e+00> : vector<5x5xf32>
    %88 = tpu.matmul %83, %85, %cst_33 {dimension_numbers = #tpu.dot_dimension_numbers<[1], [1], [0], [0], [0, 0, 1, 0], [], []>} : vector<5x8xbf16>, vector<5x8xbf16>, vector<5x5xf32> -> vector<5x5xf32>
    %cst_34 = arith.constant 0.353553385 : f32
    %89 = vector.broadcast %cst_34 : f32 to vector<5x5xf32>
    %90 = arith.mulf %88, %89 : vector<5x5xf32>
    %cst_35 = arith.constant dense<0xFF800000> : vector<5xf32>
    %91 = vector.multi_reduction <maximumf>, %90, %cst_35 [1] : vector<5x5xf32> to vector<5xf32>
    %92 = vector.shape_cast %91 : vector<5xf32> to vector<5x1xf32>
    %93 = vector.broadcast %92 : vector<5x1xf32> to vector<5x5xf32>
    %94 = arith.subf %90, %93 : vector<5x5xf32>
    %95 = math.exp %94 : vector<5x5xf32>
    %cst_36 = arith.constant dense<0.000000e+00> : vector<5xf32>
    %96 = vector.multi_reduction <add>, %95, %cst_36 [1] : vector<5x5xf32> to vector<5xf32>
    %97 = vector.shape_cast %96 : vector<5xf32> to vector<5x1xf32>
    %98 = tpu.reciprocal %97 {approx = true} : vector<5x1xf32> -> vector<5x1xf32>
    %99 = vector.broadcast %98 : vector<5x1xf32> to vector<5x5xf32>
    %100 = arith.mulf %95, %99 : vector<5x5xf32>
    %101 = arith.truncf %100 : vector<5x5xf32> to vector<5x5xbf16>
    %cst_37 = arith.constant dense<0.000000e+00> : vector<5x8xf32>
    %102 = tpu.matmul %101, %87, %cst_37 {dimension_numbers = #tpu.dot_dimension_numbers<[1], [0], [0], [1], [0, 0, 1, 1], [], []>} : vector<5x5xbf16>, vector<5x8xbf16>, vector<5x8xf32> -> vector<5x8xf32>
    %103 = vector.extract_strided_slice %39 {offsets = [0, 24], sizes = [5, 8], strides = [1, 1]} : vector<10x96xf32> to vector<5x8xf32>
    %104 = arith.truncf %103 : vector<5x8xf32> to vector<5x8xbf16>
    %105 = vector.extract_strided_slice %39 {offsets = [0, 56], sizes = [5, 8], strides = [1, 1]} : vector<10x96xf32> to vector<5x8xf32>
    %106 = arith.truncf %105 : vector<5x8xf32> to vector<5x8xbf16>
    %107 = vector.extract_strided_slice %39 {offsets = [0, 88], sizes = [5, 8], strides = [1, 1]} : vector<10x96xf32> to vector<5x8xf32>
    %108 = arith.truncf %107 : vector<5x8xf32> to vector<5x8xbf16>
    %cst_38 = arith.constant dense<0.000000e+00> : vector<5x5xf32>
    %109 = tpu.matmul %104, %106, %cst_38 {dimension_numbers = #tpu.dot_dimension_numbers<[1], [1], [0], [0], [0, 0, 1, 0], [], []>} : vector<5x8xbf16>, vector<5x8xbf16>, vector<5x5xf32> -> vector<5x5xf32>
    %cst_39 = arith.constant 0.353553385 : f32
    %110 = vector.broadcast %cst_39 : f32 to vector<5x5xf32>
    %111 = arith.mulf %109, %110 : vector<5x5xf32>
    %cst_40 = arith.constant dense<0xFF800000> : vector<5xf32>
    %112 = vector.multi_reduction <maximumf>, %111, %cst_40 [1] : vector<5x5xf32> to vector<5xf32>
    %113 = vector.shape_cast %112 : vector<5xf32> to vector<5x1xf32>
    %114 = vector.broadcast %113 : vector<5x1xf32> to vector<5x5xf32>
    %115 = arith.subf %111, %114 : vector<5x5xf32>
    %116 = math.exp %115 : vector<5x5xf32>
    %cst_41 = arith.constant dense<0.000000e+00> : vector<5xf32>
    %117 = vector.multi_reduction <add>, %116, %cst_41 [1] : vector<5x5xf32> to vector<5xf32>
    %118 = vector.shape_cast %117 : vector<5xf32> to vector<5x1xf32>
    %119 = tpu.reciprocal %118 {approx = true} : vector<5x1xf32> -> vector<5x1xf32>
    %120 = vector.broadcast %119 : vector<5x1xf32> to vector<5x5xf32>
    %121 = arith.mulf %116, %120 : vector<5x5xf32>
    %122 = arith.truncf %121 : vector<5x5xf32> to vector<5x5xbf16>
    %cst_42 = arith.constant dense<0.000000e+00> : vector<5x8xf32>
    %123 = tpu.matmul %122, %108, %cst_42 {dimension_numbers = #tpu.dot_dimension_numbers<[1], [0], [0], [1], [0, 0, 1, 1], [], []>} : vector<5x5xbf16>, vector<5x8xbf16>, vector<5x8xf32> -> vector<5x8xf32>
    %124 = tpu.concatenate %60, %81, %102, %123 in 1 : vector<5x8xf32>, vector<5x8xf32>, vector<5x8xf32>, vector<5x8xf32> -> vector<5x32xf32>
    %125 = vector.extract_strided_slice %39 {offsets = [5, 0], sizes = [5, 8], strides = [1, 1]} : vector<10x96xf32> to vector<5x8xf32>
    %126 = arith.truncf %125 : vector<5x8xf32> to vector<5x8xbf16>
    %127 = vector.extract_strided_slice %39 {offsets = [5, 32], sizes = [5, 8], strides = [1, 1]} : vector<10x96xf32> to vector<5x8xf32>
    %128 = arith.truncf %127 : vector<5x8xf32> to vector<5x8xbf16>
    %129 = vector.extract_strided_slice %39 {offsets = [5, 64], sizes = [5, 8], strides = [1, 1]} : vector<10x96xf32> to vector<5x8xf32>
    %130 = arith.truncf %129 : vector<5x8xf32> to vector<5x8xbf16>
    %cst_43 = arith.constant dense<0.000000e+00> : vector<5x5xf32>
    %131 = tpu.matmul %126, %128, %cst_43 {dimension_numbers = #tpu.dot_dimension_numbers<[1], [1], [0], [0], [0, 0, 1, 0], [], []>} : vector<5x8xbf16>, vector<5x8xbf16>, vector<5x5xf32> -> vector<5x5xf32>
    %cst_44 = arith.constant 0.353553385 : f32
    %132 = vector.broadcast %cst_44 : f32 to vector<5x5xf32>
    %133 = arith.mulf %131, %132 : vector<5x5xf32>
    %cst_45 = arith.constant dense<0xFF800000> : vector<5xf32>
    %134 = vector.multi_reduction <maximumf>, %133, %cst_45 [1] : vector<5x5xf32> to vector<5xf32>
    %135 = vector.shape_cast %134 : vector<5xf32> to vector<5x1xf32>
    %136 = vector.broadcast %135 : vector<5x1xf32> to vector<5x5xf32>
    %137 = arith.subf %133, %136 : vector<5x5xf32>
    %138 = math.exp %137 : vector<5x5xf32>
    %cst_46 = arith.constant dense<0.000000e+00> : vector<5xf32>
    %139 = vector.multi_reduction <add>, %138, %cst_46 [1] : vector<5x5xf32> to vector<5xf32>
    %140 = vector.shape_cast %139 : vector<5xf32> to vector<5x1xf32>
    %141 = tpu.reciprocal %140 {approx = true} : vector<5x1xf32> -> vector<5x1xf32>
    %142 = vector.broadcast %141 : vector<5x1xf32> to vector<5x5xf32>
    %143 = arith.mulf %138, %142 : vector<5x5xf32>
    %144 = arith.truncf %143 : vector<5x5xf32> to vector<5x5xbf16>
    %cst_47 = arith.constant dense<0.000000e+00> : vector<5x8xf32>
    %145 = tpu.matmul %144, %130, %cst_47 {dimension_numbers = #tpu.dot_dimension_numbers<[1], [0], [0], [1], [0, 0, 1, 1], [], []>} : vector<5x5xbf16>, vector<5x8xbf16>, vector<5x8xf32> -> vector<5x8xf32>
    %146 = vector.extract_strided_slice %39 {offsets = [5, 8], sizes = [5, 8], strides = [1, 1]} : vector<10x96xf32> to vector<5x8xf32>
    %147 = arith.truncf %146 : vector<5x8xf32> to vector<5x8xbf16>
    %148 = vector.extract_strided_slice %39 {offsets = [5, 40], sizes = [5, 8], strides = [1, 1]} : vector<10x96xf32> to vector<5x8xf32>
    %149 = arith.truncf %148 : vector<5x8xf32> to vector<5x8xbf16>
    %150 = vector.extract_strided_slice %39 {offsets = [5, 72], sizes = [5, 8], strides = [1, 1]} : vector<10x96xf32> to vector<5x8xf32>
    %151 = arith.truncf %150 : vector<5x8xf32> to vector<5x8xbf16>
    %cst_48 = arith.constant dense<0.000000e+00> : vector<5x5xf32>
    %152 = tpu.matmul %147, %149, %cst_48 {dimension_numbers = #tpu.dot_dimension_numbers<[1], [1], [0], [0], [0, 0, 1, 0], [], []>} : vector<5x8xbf16>, vector<5x8xbf16>, vector<5x5xf32> -> vector<5x5xf32>
    %cst_49 = arith.constant 0.353553385 : f32
    %153 = vector.broadcast %cst_49 : f32 to vector<5x5xf32>
    %154 = arith.mulf %152, %153 : vector<5x5xf32>
    %cst_50 = arith.constant dense<0xFF800000> : vector<5xf32>
    %155 = vector.multi_reduction <maximumf>, %154, %cst_50 [1] : vector<5x5xf32> to vector<5xf32>
    %156 = vector.shape_cast %155 : vector<5xf32> to vector<5x1xf32>
    %157 = vector.broadcast %156 : vector<5x1xf32> to vector<5x5xf32>
    %158 = arith.subf %154, %157 : vector<5x5xf32>
    %159 = math.exp %158 : vector<5x5xf32>
    %cst_51 = arith.constant dense<0.000000e+00> : vector<5xf32>
    %160 = vector.multi_reduction <add>, %159, %cst_51 [1] : vector<5x5xf32> to vector<5xf32>
    %161 = vector.shape_cast %160 : vector<5xf32> to vector<5x1xf32>
    %162 = tpu.reciprocal %161 {approx = true} : vector<5x1xf32> -> vector<5x1xf32>
    %163 = vector.broadcast %162 : vector<5x1xf32> to vector<5x5xf32>
    %164 = arith.mulf %159, %163 : vector<5x5xf32>
    %165 = arith.truncf %164 : vector<5x5xf32> to vector<5x5xbf16>
    %cst_52 = arith.constant dense<0.000000e+00> : vector<5x8xf32>
    %166 = tpu.matmul %165, %151, %cst_52 {dimension_numbers = #tpu.dot_dimension_numbers<[1], [0], [0], [1], [0, 0, 1, 1], [], []>} : vector<5x5xbf16>, vector<5x8xbf16>, vector<5x8xf32> -> vector<5x8xf32>
    %167 = vector.extract_strided_slice %39 {offsets = [5, 16], sizes = [5, 8], strides = [1, 1]} : vector<10x96xf32> to vector<5x8xf32>
    %168 = arith.truncf %167 : vector<5x8xf32> to vector<5x8xbf16>
    %169 = vector.extract_strided_slice %39 {offsets = [5, 48], sizes = [5, 8], strides = [1, 1]} : vector<10x96xf32> to vector<5x8xf32>
    %170 = arith.truncf %169 : vector<5x8xf32> to vector<5x8xbf16>
    %171 = vector.extract_strided_slice %39 {offsets = [5, 80], sizes = [5, 8], strides = [1, 1]} : vector<10x96xf32> to vector<5x8xf32>
    %172 = arith.truncf %171 : vector<5x8xf32> to vector<5x8xbf16>
    %cst_53 = arith.constant dense<0.000000e+00> : vector<5x5xf32>
    %173 = tpu.matmul %168, %170, %cst_53 {dimension_numbers = #tpu.dot_dimension_numbers<[1], [1], [0], [0], [0, 0, 1, 0], [], []>} : vector<5x8xbf16>, vector<5x8xbf16>, vector<5x5xf32> -> vector<5x5xf32>
    %cst_54 = arith.constant 0.353553385 : f32
    %174 = vector.broadcast %cst_54 : f32 to vector<5x5xf32>
    %175 = arith.mulf %173, %174 : vector<5x5xf32>
    %cst_55 = arith.constant dense<0xFF800000> : vector<5xf32>
    %176 = vector.multi_reduction <maximumf>, %175, %cst_55 [1] : vector<5x5xf32> to vector<5xf32>
    %177 = vector.shape_cast %176 : vector<5xf32> to vector<5x1xf32>
    %178 = vector.broadcast %177 : vector<5x1xf32> to vector<5x5xf32>
    %179 = arith.subf %175, %178 : vector<5x5xf32>
    %180 = math.exp %179 : vector<5x5xf32>
    %cst_56 = arith.constant dense<0.000000e+00> : vector<5xf32>
    %181 = vector.multi_reduction <add>, %180, %cst_56 [1] : vector<5x5xf32> to vector<5xf32>
    %182 = vector.shape_cast %181 : vector<5xf32> to vector<5x1xf32>
    %183 = tpu.reciprocal %182 {approx = true} : vector<5x1xf32> -> vector<5x1xf32>
    %184 = vector.broadcast %183 : vector<5x1xf32> to vector<5x5xf32>
    %185 = arith.mulf %180, %184 : vector<5x5xf32>
    %186 = arith.truncf %185 : vector<5x5xf32> to vector<5x5xbf16>
    %cst_57 = arith.constant dense<0.000000e+00> : vector<5x8xf32>
    %187 = tpu.matmul %186, %172, %cst_57 {dimension_numbers = #tpu.dot_dimension_numbers<[1], [0], [0], [1], [0, 0, 1, 1], [], []>} : vector<5x5xbf16>, vector<5x8xbf16>, vector<5x8xf32> -> vector<5x8xf32>
    %188 = vector.extract_strided_slice %39 {offsets = [5, 24], sizes = [5, 8], strides = [1, 1]} : vector<10x96xf32> to vector<5x8xf32>
    %189 = arith.truncf %188 : vector<5x8xf32> to vector<5x8xbf16>
    %190 = vector.extract_strided_slice %39 {offsets = [5, 56], sizes = [5, 8], strides = [1, 1]} : vector<10x96xf32> to vector<5x8xf32>
    %191 = arith.truncf %190 : vector<5x8xf32> to vector<5x8xbf16>
    %192 = vector.extract_strided_slice %39 {offsets = [5, 88], sizes = [5, 8], strides = [1, 1]} : vector<10x96xf32> to vector<5x8xf32>
    %193 = arith.truncf %192 : vector<5x8xf32> to vector<5x8xbf16>
    %cst_58 = arith.constant dense<0.000000e+00> : vector<5x5xf32>
    %194 = tpu.matmul %189, %191, %cst_58 {dimension_numbers = #tpu.dot_dimension_numbers<[1], [1], [0], [0], [0, 0, 1, 0], [], []>} : vector<5x8xbf16>, vector<5x8xbf16>, vector<5x5xf32> -> vector<5x5xf32>
    %cst_59 = arith.constant 0.353553385 : f32
    %195 = vector.broadcast %cst_59 : f32 to vector<5x5xf32>
    %196 = arith.mulf %194, %195 : vector<5x5xf32>
    %cst_60 = arith.constant dense<0xFF800000> : vector<5xf32>
    %197 = vector.multi_reduction <maximumf>, %196, %cst_60 [1] : vector<5x5xf32> to vector<5xf32>
    %198 = vector.shape_cast %197 : vector<5xf32> to vector<5x1xf32>
    %199 = vector.broadcast %198 : vector<5x1xf32> to vector<5x5xf32>
    %200 = arith.subf %196, %199 : vector<5x5xf32>
    %201 = math.exp %200 : vector<5x5xf32>
    %cst_61 = arith.constant dense<0.000000e+00> : vector<5xf32>
    %202 = vector.multi_reduction <add>, %201, %cst_61 [1] : vector<5x5xf32> to vector<5xf32>
    %203 = vector.shape_cast %202 : vector<5xf32> to vector<5x1xf32>
    %204 = tpu.reciprocal %203 {approx = true} : vector<5x1xf32> -> vector<5x1xf32>
    %205 = vector.broadcast %204 : vector<5x1xf32> to vector<5x5xf32>
    %206 = arith.mulf %201, %205 : vector<5x5xf32>
    %207 = arith.truncf %206 : vector<5x5xf32> to vector<5x5xbf16>
    %cst_62 = arith.constant dense<0.000000e+00> : vector<5x8xf32>
    %208 = tpu.matmul %207, %193, %cst_62 {dimension_numbers = #tpu.dot_dimension_numbers<[1], [0], [0], [1], [0, 0, 1, 1], [], []>} : vector<5x5xbf16>, vector<5x8xbf16>, vector<5x8xf32> -> vector<5x8xf32>
    %209 = tpu.concatenate %145, %166, %187, %208 in 1 : vector<5x8xf32>, vector<5x8xf32>, vector<5x8xf32>, vector<5x8xf32> -> vector<5x32xf32>
    %210 = tpu.concatenate %124, %209 in 0 : vector<5x32xf32>, vector<5x32xf32> -> vector<10x32xf32>
    %211 = arith.truncf %210 : vector<10x32xf32> to vector<10x32xbf16>
    %c0_63 = arith.constant 0 : index
    %c0_64 = arith.constant 0 : index
    %c0_65 = arith.constant 0 : index
    %212 = vector.load %arg7[%c0_63, %c0_64, %c0_65] : memref<2x32x32xbf16, #tpu.memory_space<vmem>>, vector<1x32x32xbf16>
    %213 = vector.shape_cast %212 : vector<1x32x32xbf16> to vector<32x32xbf16>
    %cst_66 = arith.constant dense<0.000000e+00> : vector<10x32xf32>
    %214 = tpu.matmul %211, %213, %cst_66 {dimension_numbers = #tpu.dot_dimension_numbers<[1], [0], [0], [1], [0, 0, 1, 1], [], []>} : vector<10x32xbf16>, vector<32x32xbf16>, vector<10x32xf32> -> vector<10x32xf32>
    %215 = arith.addf %5, %214 : vector<10x32xf32>
    %c0_67 = arith.constant 0 : index
    %c0_68 = arith.constant 0 : index
    %c0_69 = arith.constant 0 : index
    %216 = vector.load %arg8[%c0_67, %c0_68, %c0_69] : memref<2x1x32xf32, #tpu.memory_space<vmem>>, vector<1x1x32xf32>
    %217 = vector.shape_cast %216 : vector<1x1x32xf32> to vector<1x32xf32>
    %218 = vector.broadcast %217 : vector<1x32xf32> to vector<10x32xf32>
    %219 = arith.addf %215, %218 : vector<10x32xf32>
    %c0_70 = arith.constant 0 : index
    %c0_71 = arith.constant 0 : index
    %c0_72 = arith.constant 0 : index
    %220 = vector.load %arg9[%c0_70, %c0_71, %c0_72] : memref<2x1x32xf32, #tpu.memory_space<vmem>>, vector<1x1x32xf32>
    %221 = vector.shape_cast %220 : vector<1x1x32xf32> to vector<1x32xf32>
    %c0_73 = arith.constant 0 : index
    %c0_74 = arith.constant 0 : index
    %c0_75 = arith.constant 0 : index
    %222 = vector.load %arg10[%c0_73, %c0_74, %c0_75] : memref<2x1x32xf32, #tpu.memory_space<vmem>>, vector<1x1x32xf32>
    %223 = vector.shape_cast %222 : vector<1x1x32xf32> to vector<1x32xf32>
    %cst_76 = arith.constant dense<0.000000e+00> : vector<10xf32>
    %224 = vector.multi_reduction <add>, %219, %cst_76 [1] : vector<10x32xf32> to vector<10xf32>
    %225 = vector.shape_cast %224 : vector<10xf32> to vector<10x1xf32>
    %cst_77 = arith.constant 3.200000e+01 : f32
    %226 = vector.broadcast %cst_77 : f32 to vector<10x1xf32>
    %227 = arith.divf %225, %226 : vector<10x1xf32>
    %228 = vector.broadcast %227 : vector<10x1xf32> to vector<10x32xf32>
    %229 = arith.subf %219, %228 : vector<10x32xf32>
    %230 = arith.mulf %229, %229 : vector<10x32xf32>
    %cst_78 = arith.constant dense<0.000000e+00> : vector<10xf32>
    %231 = vector.multi_reduction <add>, %230, %cst_78 [1] : vector<10x32xf32> to vector<10xf32>
    %232 = vector.shape_cast %231 : vector<10xf32> to vector<10x1xf32>
    %cst_79 = arith.constant 3.200000e+01 : f32
    %233 = vector.broadcast %cst_79 : f32 to vector<10x1xf32>
    %234 = arith.divf %232, %233 : vector<10x1xf32>
    %235 = vector.broadcast %227 : vector<10x1xf32> to vector<10x32xf32>
    %236 = arith.subf %219, %235 : vector<10x32xf32>
    %cst_80 = arith.constant 9.99999974E-6 : f32
    %237 = vector.broadcast %cst_80 : f32 to vector<10x1xf32>
    %238 = arith.addf %234, %237 : vector<10x1xf32>
    %239 = math.rsqrt %238 : vector<10x1xf32>
    %240 = vector.broadcast %239 : vector<10x1xf32> to vector<10x32xf32>
    %241 = arith.mulf %236, %240 : vector<10x32xf32>
    %242 = vector.broadcast %221 : vector<1x32xf32> to vector<10x32xf32>
    %243 = arith.mulf %241, %242 : vector<10x32xf32>
    %244 = vector.broadcast %223 : vector<1x32xf32> to vector<10x32xf32>
    %245 = arith.addf %243, %244 : vector<10x32xf32>
    %246 = arith.truncf %245 : vector<10x32xf32> to vector<10x32xbf16>
    %c0_81 = arith.constant 0 : index
    %c0_82 = arith.constant 0 : index
    %c0_83 = arith.constant 0 : index
    %247 = vector.load %arg11[%c0_81, %c0_82, %c0_83] : memref<2x32x64xbf16, #tpu.memory_space<vmem>>, vector<1x32x64xbf16>
    %248 = vector.shape_cast %247 : vector<1x32x64xbf16> to vector<32x64xbf16>
    %cst_84 = arith.constant dense<0.000000e+00> : vector<10x64xf32>
    %249 = tpu.matmul %246, %248, %cst_84 {dimension_numbers = #tpu.dot_dimension_numbers<[1], [0], [0], [1], [0, 0, 1, 1], [], []>} : vector<10x32xbf16>, vector<32x64xbf16>, vector<10x64xf32> -> vector<10x64xf32>
    %c0_85 = arith.constant 0 : index
    %c0_86 = arith.constant 0 : index
    %c0_87 = arith.constant 0 : index
    %250 = vector.load %arg12[%c0_85, %c0_86, %c0_87] : memref<2x1x64xf32, #tpu.memory_space<vmem>>, vector<1x1x64xf32>
    %251 = vector.shape_cast %250 : vector<1x1x64xf32> to vector<1x64xf32>
    %252 = vector.broadcast %251 : vector<1x64xf32> to vector<10x64xf32>
    %253 = arith.addf %249, %252 : vector<10x64xf32>
    %254 = arith.mulf %253, %253 : vector<10x64xf32>
    %255 = arith.mulf %253, %254 : vector<10x64xf32>
    %cst_88 = arith.constant 4.471500e-02 : f32
    %256 = vector.broadcast %cst_88 : f32 to vector<10x64xf32>
    %257 = arith.mulf %256, %255 : vector<10x64xf32>
    %258 = arith.addf %253, %257 : vector<10x64xf32>
    %cst_89 = arith.constant 0.797884583 : f32
    %259 = vector.broadcast %cst_89 : f32 to vector<10x64xf32>
    %260 = arith.mulf %259, %258 : vector<10x64xf32>
    %261 = math.tanh %260 : vector<10x64xf32>
    %cst_90 = arith.constant 1.000000e+00 : f32
    %262 = vector.broadcast %cst_90 : f32 to vector<10x64xf32>
    %263 = arith.addf %262, %261 : vector<10x64xf32>
    %cst_91 = arith.constant 5.000000e-01 : f32
    %264 = vector.broadcast %cst_91 : f32 to vector<10x64xf32>
    %265 = arith.mulf %264, %263 : vector<10x64xf32>
    %266 = arith.mulf %253, %265 : vector<10x64xf32>
    %267 = arith.truncf %266 : vector<10x64xf32> to vector<10x64xbf16>
    %c0_92 = arith.constant 0 : index
    %c0_93 = arith.constant 0 : index
    %c0_94 = arith.constant 0 : index
    %268 = vector.load %arg13[%c0_92, %c0_93, %c0_94] : memref<2x64x32xbf16, #tpu.memory_space<vmem>>, vector<1x64x32xbf16>
    %269 = vector.shape_cast %268 : vector<1x64x32xbf16> to vector<64x32xbf16>
    %cst_95 = arith.constant dense<0.000000e+00> : vector<10x32xf32>
    %270 = tpu.matmul %267, %269, %cst_95 {dimension_numbers = #tpu.dot_dimension_numbers<[1], [0], [0], [1], [0, 0, 1, 1], [], []>} : vector<10x64xbf16>, vector<64x32xbf16>, vector<10x32xf32> -> vector<10x32xf32>
    %271 = arith.addf %219, %270 : vector<10x32xf32>
    %c0_96 = arith.constant 0 : index
    %c0_97 = arith.constant 0 : index
    %c0_98 = arith.constant 0 : index
    %272 = vector.load %arg14[%c0_96, %c0_97, %c0_98] : memref<2x1x32xf32, #tpu.memory_space<vmem>>, vector<1x1x32xf32>
    %273 = vector.shape_cast %272 : vector<1x1x32xf32> to vector<1x32xf32>
    %274 = vector.broadcast %273 : vector<1x32xf32> to vector<10x32xf32>
    %275 = arith.addf %271, %274 : vector<10x32xf32>
    %c1 = arith.constant 1 : index
    %c0_99 = arith.constant 0 : index
    %c0_100 = arith.constant 0 : index
    %276 = vector.load %arg3[%c1, %c0_99, %c0_100] : memref<2x1x32xf32, #tpu.memory_space<vmem>>, vector<1x1x32xf32>
    %277 = vector.shape_cast %276 : vector<1x1x32xf32> to vector<1x32xf32>
    %c1_101 = arith.constant 1 : index
    %c0_102 = arith.constant 0 : index
    %c0_103 = arith.constant 0 : index
    %278 = vector.load %arg4[%c1_101, %c0_102, %c0_103] : memref<2x1x32xf32, #tpu.memory_space<vmem>>, vector<1x1x32xf32>
    %279 = vector.shape_cast %278 : vector<1x1x32xf32> to vector<1x32xf32>
    %cst_104 = arith.constant dense<0.000000e+00> : vector<10xf32>
    %280 = vector.multi_reduction <add>, %275, %cst_104 [1] : vector<10x32xf32> to vector<10xf32>
    %281 = vector.shape_cast %280 : vector<10xf32> to vector<10x1xf32>
    %cst_105 = arith.constant 3.200000e+01 : f32
    %282 = vector.broadcast %cst_105 : f32 to vector<10x1xf32>
    %283 = arith.divf %281, %282 : vector<10x1xf32>
    %284 = vector.broadcast %283 : vector<10x1xf32> to vector<10x32xf32>
    %285 = arith.subf %275, %284 : vector<10x32xf32>
    %286 = arith.mulf %285, %285 : vector<10x32xf32>
    %cst_106 = arith.constant dense<0.000000e+00> : vector<10xf32>
    %287 = vector.multi_reduction <add>, %286, %cst_106 [1] : vector<10x32xf32> to vector<10xf32>
    %288 = vector.shape_cast %287 : vector<10xf32> to vector<10x1xf32>
    %cst_107 = arith.constant 3.200000e+01 : f32
    %289 = vector.broadcast %cst_107 : f32 to vector<10x1xf32>
    %290 = arith.divf %288, %289 : vector<10x1xf32>
    %291 = vector.broadcast %283 : vector<10x1xf32> to vector<10x32xf32>
    %292 = arith.subf %275, %291 : vector<10x32xf32>
    %cst_108 = arith.constant 9.99999974E-6 : f32
    %293 = vector.broadcast %cst_108 : f32 to vector<10x1xf32>
    %294 = arith.addf %290, %293 : vector<10x1xf32>
    %295 = math.rsqrt %294 : vector<10x1xf32>
    %296 = vector.broadcast %295 : vector<10x1xf32> to vector<10x32xf32>
    %297 = arith.mulf %292, %296 : vector<10x32xf32>
    %298 = vector.broadcast %277 : vector<1x32xf32> to vector<10x32xf32>
    %299 = arith.mulf %297, %298 : vector<10x32xf32>
    %300 = vector.broadcast %279 : vector<1x32xf32> to vector<10x32xf32>
    %301 = arith.addf %299, %300 : vector<10x32xf32>
    %302 = arith.truncf %301 : vector<10x32xf32> to vector<10x32xbf16>
    %c1_109 = arith.constant 1 : index
    %c0_110 = arith.constant 0 : index
    %c0_111 = arith.constant 0 : index
    %303 = vector.load %arg5[%c1_109, %c0_110, %c0_111] : memref<2x32x96xbf16, #tpu.memory_space<vmem>>, vector<1x32x96xbf16>
    %304 = vector.shape_cast %303 : vector<1x32x96xbf16> to vector<32x96xbf16>
    %cst_112 = arith.constant dense<0.000000e+00> : vector<10x96xf32>
    %305 = tpu.matmul %302, %304, %cst_112 {dimension_numbers = #tpu.dot_dimension_numbers<[1], [0], [0], [1], [0, 0, 1, 1], [], []>} : vector<10x32xbf16>, vector<32x96xbf16>, vector<10x96xf32> -> vector<10x96xf32>
    %c1_113 = arith.constant 1 : index
    %c0_114 = arith.constant 0 : index
    %c0_115 = arith.constant 0 : index
    %306 = vector.load %arg6[%c1_113, %c0_114, %c0_115] : memref<2x1x96xf32, #tpu.memory_space<vmem>>, vector<1x1x96xf32>
    %307 = vector.shape_cast %306 : vector<1x1x96xf32> to vector<1x96xf32>
    %308 = vector.broadcast %307 : vector<1x96xf32> to vector<10x96xf32>
    %309 = arith.addf %305, %308 : vector<10x96xf32>
    %310 = vector.extract_strided_slice %309 {offsets = [0, 0], sizes = [5, 8], strides = [1, 1]} : vector<10x96xf32> to vector<5x8xf32>
    %311 = arith.truncf %310 : vector<5x8xf32> to vector<5x8xbf16>
    %312 = vector.extract_strided_slice %309 {offsets = [0, 32], sizes = [5, 8], strides = [1, 1]} : vector<10x96xf32> to vector<5x8xf32>
    %313 = arith.truncf %312 : vector<5x8xf32> to vector<5x8xbf16>
    %314 = vector.extract_strided_slice %309 {offsets = [0, 64], sizes = [5, 8], strides = [1, 1]} : vector<10x96xf32> to vector<5x8xf32>
    %315 = arith.truncf %314 : vector<5x8xf32> to vector<5x8xbf16>
    %cst_116 = arith.constant dense<0.000000e+00> : vector<5x5xf32>
    %316 = tpu.matmul %311, %313, %cst_116 {dimension_numbers = #tpu.dot_dimension_numbers<[1], [1], [0], [0], [0, 0, 1, 0], [], []>} : vector<5x8xbf16>, vector<5x8xbf16>, vector<5x5xf32> -> vector<5x5xf32>
    %cst_117 = arith.constant 0.353553385 : f32
    %317 = vector.broadcast %cst_117 : f32 to vector<5x5xf32>
    %318 = arith.mulf %316, %317 : vector<5x5xf32>
    %cst_118 = arith.constant dense<0xFF800000> : vector<5xf32>
    %319 = vector.multi_reduction <maximumf>, %318, %cst_118 [1] : vector<5x5xf32> to vector<5xf32>
    %320 = vector.shape_cast %319 : vector<5xf32> to vector<5x1xf32>
    %321 = vector.broadcast %320 : vector<5x1xf32> to vector<5x5xf32>
    %322 = arith.subf %318, %321 : vector<5x5xf32>
    %323 = math.exp %322 : vector<5x5xf32>
    %cst_119 = arith.constant dense<0.000000e+00> : vector<5xf32>
    %324 = vector.multi_reduction <add>, %323, %cst_119 [1] : vector<5x5xf32> to vector<5xf32>
    %325 = vector.shape_cast %324 : vector<5xf32> to vector<5x1xf32>
    %326 = tpu.reciprocal %325 {approx = true} : vector<5x1xf32> -> vector<5x1xf32>
    %327 = vector.broadcast %326 : vector<5x1xf32> to vector<5x5xf32>
    %328 = arith.mulf %323, %327 : vector<5x5xf32>
    %329 = arith.truncf %328 : vector<5x5xf32> to vector<5x5xbf16>
    %cst_120 = arith.constant dense<0.000000e+00> : vector<5x8xf32>
    %330 = tpu.matmul %329, %315, %cst_120 {dimension_numbers = #tpu.dot_dimension_numbers<[1], [0], [0], [1], [0, 0, 1, 1], [], []>} : vector<5x5xbf16>, vector<5x8xbf16>, vector<5x8xf32> -> vector<5x8xf32>
    %331 = vector.extract_strided_slice %309 {offsets = [0, 8], sizes = [5, 8], strides = [1, 1]} : vector<10x96xf32> to vector<5x8xf32>
    %332 = arith.truncf %331 : vector<5x8xf32> to vector<5x8xbf16>
    %333 = vector.extract_strided_slice %309 {offsets = [0, 40], sizes = [5, 8], strides = [1, 1]} : vector<10x96xf32> to vector<5x8xf32>
    %334 = arith.truncf %333 : vector<5x8xf32> to vector<5x8xbf16>
    %335 = vector.extract_strided_slice %309 {offsets = [0, 72], sizes = [5, 8], strides = [1, 1]} : vector<10x96xf32> to vector<5x8xf32>
    %336 = arith.truncf %335 : vector<5x8xf32> to vector<5x8xbf16>
    %cst_121 = arith.constant dense<0.000000e+00> : vector<5x5xf32>
    %337 = tpu.matmul %332, %334, %cst_121 {dimension_numbers = #tpu.dot_dimension_numbers<[1], [1], [0], [0], [0, 0, 1, 0], [], []>} : vector<5x8xbf16>, vector<5x8xbf16>, vector<5x5xf32> -> vector<5x5xf32>
    %cst_122 = arith.constant 0.353553385 : f32
    %338 = vector.broadcast %cst_122 : f32 to vector<5x5xf32>
    %339 = arith.mulf %337, %338 : vector<5x5xf32>
    %cst_123 = arith.constant dense<0xFF800000> : vector<5xf32>
    %340 = vector.multi_reduction <maximumf>, %339, %cst_123 [1] : vector<5x5xf32> to vector<5xf32>
    %341 = vector.shape_cast %340 : vector<5xf32> to vector<5x1xf32>
    %342 = vector.broadcast %341 : vector<5x1xf32> to vector<5x5xf32>
    %343 = arith.subf %339, %342 : vector<5x5xf32>
    %344 = math.exp %343 : vector<5x5xf32>
    %cst_124 = arith.constant dense<0.000000e+00> : vector<5xf32>
    %345 = vector.multi_reduction <add>, %344, %cst_124 [1] : vector<5x5xf32> to vector<5xf32>
    %346 = vector.shape_cast %345 : vector<5xf32> to vector<5x1xf32>
    %347 = tpu.reciprocal %346 {approx = true} : vector<5x1xf32> -> vector<5x1xf32>
    %348 = vector.broadcast %347 : vector<5x1xf32> to vector<5x5xf32>
    %349 = arith.mulf %344, %348 : vector<5x5xf32>
    %350 = arith.truncf %349 : vector<5x5xf32> to vector<5x5xbf16>
    %cst_125 = arith.constant dense<0.000000e+00> : vector<5x8xf32>
    %351 = tpu.matmul %350, %336, %cst_125 {dimension_numbers = #tpu.dot_dimension_numbers<[1], [0], [0], [1], [0, 0, 1, 1], [], []>} : vector<5x5xbf16>, vector<5x8xbf16>, vector<5x8xf32> -> vector<5x8xf32>
    %352 = vector.extract_strided_slice %309 {offsets = [0, 16], sizes = [5, 8], strides = [1, 1]} : vector<10x96xf32> to vector<5x8xf32>
    %353 = arith.truncf %352 : vector<5x8xf32> to vector<5x8xbf16>
    %354 = vector.extract_strided_slice %309 {offsets = [0, 48], sizes = [5, 8], strides = [1, 1]} : vector<10x96xf32> to vector<5x8xf32>
    %355 = arith.truncf %354 : vector<5x8xf32> to vector<5x8xbf16>
    %356 = vector.extract_strided_slice %309 {offsets = [0, 80], sizes = [5, 8], strides = [1, 1]} : vector<10x96xf32> to vector<5x8xf32>
    %357 = arith.truncf %356 : vector<5x8xf32> to vector<5x8xbf16>
    %cst_126 = arith.constant dense<0.000000e+00> : vector<5x5xf32>
    %358 = tpu.matmul %353, %355, %cst_126 {dimension_numbers = #tpu.dot_dimension_numbers<[1], [1], [0], [0], [0, 0, 1, 0], [], []>} : vector<5x8xbf16>, vector<5x8xbf16>, vector<5x5xf32> -> vector<5x5xf32>
    %cst_127 = arith.constant 0.353553385 : f32
    %359 = vector.broadcast %cst_127 : f32 to vector<5x5xf32>
    %360 = arith.mulf %358, %359 : vector<5x5xf32>
    %cst_128 = arith.constant dense<0xFF800000> : vector<5xf32>
    %361 = vector.multi_reduction <maximumf>, %360, %cst_128 [1] : vector<5x5xf32> to vector<5xf32>
    %362 = vector.shape_cast %361 : vector<5xf32> to vector<5x1xf32>
    %363 = vector.broadcast %362 : vector<5x1xf32> to vector<5x5xf32>
    %364 = arith.subf %360, %363 : vector<5x5xf32>
    %365 = math.exp %364 : vector<5x5xf32>
    %cst_129 = arith.constant dense<0.000000e+00> : vector<5xf32>
    %366 = vector.multi_reduction <add>, %365, %cst_129 [1] : vector<5x5xf32> to vector<5xf32>
    %367 = vector.shape_cast %366 : vector<5xf32> to vector<5x1xf32>
    %368 = tpu.reciprocal %367 {approx = true} : vector<5x1xf32> -> vector<5x1xf32>
    %369 = vector.broadcast %368 : vector<5x1xf32> to vector<5x5xf32>
    %370 = arith.mulf %365, %369 : vector<5x5xf32>
    %371 = arith.truncf %370 : vector<5x5xf32> to vector<5x5xbf16>
    %cst_130 = arith.constant dense<0.000000e+00> : vector<5x8xf32>
    %372 = tpu.matmul %371, %357, %cst_130 {dimension_numbers = #tpu.dot_dimension_numbers<[1], [0], [0], [1], [0, 0, 1, 1], [], []>} : vector<5x5xbf16>, vector<5x8xbf16>, vector<5x8xf32> -> vector<5x8xf32>
    %373 = vector.extract_strided_slice %309 {offsets = [0, 24], sizes = [5, 8], strides = [1, 1]} : vector<10x96xf32> to vector<5x8xf32>
    %374 = arith.truncf %373 : vector<5x8xf32> to vector<5x8xbf16>
    %375 = vector.extract_strided_slice %309 {offsets = [0, 56], sizes = [5, 8], strides = [1, 1]} : vector<10x96xf32> to vector<5x8xf32>
    %376 = arith.truncf %375 : vector<5x8xf32> to vector<5x8xbf16>
    %377 = vector.extract_strided_slice %309 {offsets = [0, 88], sizes = [5, 8], strides = [1, 1]} : vector<10x96xf32> to vector<5x8xf32>
    %378 = arith.truncf %377 : vector<5x8xf32> to vector<5x8xbf16>
    %cst_131 = arith.constant dense<0.000000e+00> : vector<5x5xf32>
    %379 = tpu.matmul %374, %376, %cst_131 {dimension_numbers = #tpu.dot_dimension_numbers<[1], [1], [0], [0], [0, 0, 1, 0], [], []>} : vector<5x8xbf16>, vector<5x8xbf16>, vector<5x5xf32> -> vector<5x5xf32>
    %cst_132 = arith.constant 0.353553385 : f32
    %380 = vector.broadcast %cst_132 : f32 to vector<5x5xf32>
    %381 = arith.mulf %379, %380 : vector<5x5xf32>
    %cst_133 = arith.constant dense<0xFF800000> : vector<5xf32>
    %382 = vector.multi_reduction <maximumf>, %381, %cst_133 [1] : vector<5x5xf32> to vector<5xf32>
    %383 = vector.shape_cast %382 : vector<5xf32> to vector<5x1xf32>
    %384 = vector.broadcast %383 : vector<5x1xf32> to vector<5x5xf32>
    %385 = arith.subf %381, %384 : vector<5x5xf32>
    %386 = math.exp %385 : vector<5x5xf32>
    %cst_134 = arith.constant dense<0.000000e+00> : vector<5xf32>
    %387 = vector.multi_reduction <add>, %386, %cst_134 [1] : vector<5x5xf32> to vector<5xf32>
    %388 = vector.shape_cast %387 : vector<5xf32> to vector<5x1xf32>
    %389 = tpu.reciprocal %388 {approx = true} : vector<5x1xf32> -> vector<5x1xf32>
    %390 = vector.broadcast %389 : vector<5x1xf32> to vector<5x5xf32>
    %391 = arith.mulf %386, %390 : vector<5x5xf32>
    %392 = arith.truncf %391 : vector<5x5xf32> to vector<5x5xbf16>
    %cst_135 = arith.constant dense<0.000000e+00> : vector<5x8xf32>
    %393 = tpu.matmul %392, %378, %cst_135 {dimension_numbers = #tpu.dot_dimension_numbers<[1], [0], [0], [1], [0, 0, 1, 1], [], []>} : vector<5x5xbf16>, vector<5x8xbf16>, vector<5x8xf32> -> vector<5x8xf32>
    %394 = tpu.concatenate %330, %351, %372, %393 in 1 : vector<5x8xf32>, vector<5x8xf32>, vector<5x8xf32>, vector<5x8xf32> -> vector<5x32xf32>
    %395 = vector.extract_strided_slice %309 {offsets = [5, 0], sizes = [5, 8], strides = [1, 1]} : vector<10x96xf32> to vector<5x8xf32>
    %396 = arith.truncf %395 : vector<5x8xf32> to vector<5x8xbf16>
    %397 = vector.extract_strided_slice %309 {offsets = [5, 32], sizes = [5, 8], strides = [1, 1]} : vector<10x96xf32> to vector<5x8xf32>
    %398 = arith.truncf %397 : vector<5x8xf32> to vector<5x8xbf16>
    %399 = vector.extract_strided_slice %309 {offsets = [5, 64], sizes = [5, 8], strides = [1, 1]} : vector<10x96xf32> to vector<5x8xf32>
    %400 = arith.truncf %399 : vector<5x8xf32> to vector<5x8xbf16>
    %cst_136 = arith.constant dense<0.000000e+00> : vector<5x5xf32>
    %401 = tpu.matmul %396, %398, %cst_136 {dimension_numbers = #tpu.dot_dimension_numbers<[1], [1], [0], [0], [0, 0, 1, 0], [], []>} : vector<5x8xbf16>, vector<5x8xbf16>, vector<5x5xf32> -> vector<5x5xf32>
    %cst_137 = arith.constant 0.353553385 : f32
    %402 = vector.broadcast %cst_137 : f32 to vector<5x5xf32>
    %403 = arith.mulf %401, %402 : vector<5x5xf32>
    %cst_138 = arith.constant dense<0xFF800000> : vector<5xf32>
    %404 = vector.multi_reduction <maximumf>, %403, %cst_138 [1] : vector<5x5xf32> to vector<5xf32>
    %405 = vector.shape_cast %404 : vector<5xf32> to vector<5x1xf32>
    %406 = vector.broadcast %405 : vector<5x1xf32> to vector<5x5xf32>
    %407 = arith.subf %403, %406 : vector<5x5xf32>
    %408 = math.exp %407 : vector<5x5xf32>
    %cst_139 = arith.constant dense<0.000000e+00> : vector<5xf32>
    %409 = vector.multi_reduction <add>, %408, %cst_139 [1] : vector<5x5xf32> to vector<5xf32>
    %410 = vector.shape_cast %409 : vector<5xf32> to vector<5x1xf32>
    %411 = tpu.reciprocal %410 {approx = true} : vector<5x1xf32> -> vector<5x1xf32>
    %412 = vector.broadcast %411 : vector<5x1xf32> to vector<5x5xf32>
    %413 = arith.mulf %408, %412 : vector<5x5xf32>
    %414 = arith.truncf %413 : vector<5x5xf32> to vector<5x5xbf16>
    %cst_140 = arith.constant dense<0.000000e+00> : vector<5x8xf32>
    %415 = tpu.matmul %414, %400, %cst_140 {dimension_numbers = #tpu.dot_dimension_numbers<[1], [0], [0], [1], [0, 0, 1, 1], [], []>} : vector<5x5xbf16>, vector<5x8xbf16>, vector<5x8xf32> -> vector<5x8xf32>
    %416 = vector.extract_strided_slice %309 {offsets = [5, 8], sizes = [5, 8], strides = [1, 1]} : vector<10x96xf32> to vector<5x8xf32>
    %417 = arith.truncf %416 : vector<5x8xf32> to vector<5x8xbf16>
    %418 = vector.extract_strided_slice %309 {offsets = [5, 40], sizes = [5, 8], strides = [1, 1]} : vector<10x96xf32> to vector<5x8xf32>
    %419 = arith.truncf %418 : vector<5x8xf32> to vector<5x8xbf16>
    %420 = vector.extract_strided_slice %309 {offsets = [5, 72], sizes = [5, 8], strides = [1, 1]} : vector<10x96xf32> to vector<5x8xf32>
    %421 = arith.truncf %420 : vector<5x8xf32> to vector<5x8xbf16>
    %cst_141 = arith.constant dense<0.000000e+00> : vector<5x5xf32>
    %422 = tpu.matmul %417, %419, %cst_141 {dimension_numbers = #tpu.dot_dimension_numbers<[1], [1], [0], [0], [0, 0, 1, 0], [], []>} : vector<5x8xbf16>, vector<5x8xbf16>, vector<5x5xf32> -> vector<5x5xf32>
    %cst_142 = arith.constant 0.353553385 : f32
    %423 = vector.broadcast %cst_142 : f32 to vector<5x5xf32>
    %424 = arith.mulf %422, %423 : vector<5x5xf32>
    %cst_143 = arith.constant dense<0xFF800000> : vector<5xf32>
    %425 = vector.multi_reduction <maximumf>, %424, %cst_143 [1] : vector<5x5xf32> to vector<5xf32>
    %426 = vector.shape_cast %425 : vector<5xf32> to vector<5x1xf32>
    %427 = vector.broadcast %426 : vector<5x1xf32> to vector<5x5xf32>
    %428 = arith.subf %424, %427 : vector<5x5xf32>
    %429 = math.exp %428 : vector<5x5xf32>
    %cst_144 = arith.constant dense<0.000000e+00> : vector<5xf32>
    %430 = vector.multi_reduction <add>, %429, %cst_144 [1] : vector<5x5xf32> to vector<5xf32>
    %431 = vector.shape_cast %430 : vector<5xf32> to vector<5x1xf32>
    %432 = tpu.reciprocal %431 {approx = true} : vector<5x1xf32> -> vector<5x1xf32>
    %433 = vector.broadcast %432 : vector<5x1xf32> to vector<5x5xf32>
    %434 = arith.mulf %429, %433 : vector<5x5xf32>
    %435 = arith.truncf %434 : vector<5x5xf32> to vector<5x5xbf16>
    %cst_145 = arith.constant dense<0.000000e+00> : vector<5x8xf32>
    %436 = tpu.matmul %435, %421, %cst_145 {dimension_numbers = #tpu.dot_dimension_numbers<[1], [0], [0], [1], [0, 0, 1, 1], [], []>} : vector<5x5xbf16>, vector<5x8xbf16>, vector<5x8xf32> -> vector<5x8xf32>
    %437 = vector.extract_strided_slice %309 {offsets = [5, 16], sizes = [5, 8], strides = [1, 1]} : vector<10x96xf32> to vector<5x8xf32>
    %438 = arith.truncf %437 : vector<5x8xf32> to vector<5x8xbf16>
    %439 = vector.extract_strided_slice %309 {offsets = [5, 48], sizes = [5, 8], strides = [1, 1]} : vector<10x96xf32> to vector<5x8xf32>
    %440 = arith.truncf %439 : vector<5x8xf32> to vector<5x8xbf16>
    %441 = vector.extract_strided_slice %309 {offsets = [5, 80], sizes = [5, 8], strides = [1, 1]} : vector<10x96xf32> to vector<5x8xf32>
    %442 = arith.truncf %441 : vector<5x8xf32> to vector<5x8xbf16>
    %cst_146 = arith.constant dense<0.000000e+00> : vector<5x5xf32>
    %443 = tpu.matmul %438, %440, %cst_146 {dimension_numbers = #tpu.dot_dimension_numbers<[1], [1], [0], [0], [0, 0, 1, 0], [], []>} : vector<5x8xbf16>, vector<5x8xbf16>, vector<5x5xf32> -> vector<5x5xf32>
    %cst_147 = arith.constant 0.353553385 : f32
    %444 = vector.broadcast %cst_147 : f32 to vector<5x5xf32>
    %445 = arith.mulf %443, %444 : vector<5x5xf32>
    %cst_148 = arith.constant dense<0xFF800000> : vector<5xf32>
    %446 = vector.multi_reduction <maximumf>, %445, %cst_148 [1] : vector<5x5xf32> to vector<5xf32>
    %447 = vector.shape_cast %446 : vector<5xf32> to vector<5x1xf32>
    %448 = vector.broadcast %447 : vector<5x1xf32> to vector<5x5xf32>
    %449 = arith.subf %445, %448 : vector<5x5xf32>
    %450 = math.exp %449 : vector<5x5xf32>
    %cst_149 = arith.constant dense<0.000000e+00> : vector<5xf32>
    %451 = vector.multi_reduction <add>, %450, %cst_149 [1] : vector<5x5xf32> to vector<5xf32>
    %452 = vector.shape_cast %451 : vector<5xf32> to vector<5x1xf32>
    %453 = tpu.reciprocal %452 {approx = true} : vector<5x1xf32> -> vector<5x1xf32>
    %454 = vector.broadcast %453 : vector<5x1xf32> to vector<5x5xf32>
    %455 = arith.mulf %450, %454 : vector<5x5xf32>
    %456 = arith.truncf %455 : vector<5x5xf32> to vector<5x5xbf16>
    %cst_150 = arith.constant dense<0.000000e+00> : vector<5x8xf32>
    %457 = tpu.matmul %456, %442, %cst_150 {dimension_numbers = #tpu.dot_dimension_numbers<[1], [0], [0], [1], [0, 0, 1, 1], [], []>} : vector<5x5xbf16>, vector<5x8xbf16>, vector<5x8xf32> -> vector<5x8xf32>
    %458 = vector.extract_strided_slice %309 {offsets = [5, 24], sizes = [5, 8], strides = [1, 1]} : vector<10x96xf32> to vector<5x8xf32>
    %459 = arith.truncf %458 : vector<5x8xf32> to vector<5x8xbf16>
    %460 = vector.extract_strided_slice %309 {offsets = [5, 56], sizes = [5, 8], strides = [1, 1]} : vector<10x96xf32> to vector<5x8xf32>
    %461 = arith.truncf %460 : vector<5x8xf32> to vector<5x8xbf16>
    %462 = vector.extract_strided_slice %309 {offsets = [5, 88], sizes = [5, 8], strides = [1, 1]} : vector<10x96xf32> to vector<5x8xf32>
    %463 = arith.truncf %462 : vector<5x8xf32> to vector<5x8xbf16>
    %cst_151 = arith.constant dense<0.000000e+00> : vector<5x5xf32>
    %464 = tpu.matmul %459, %461, %cst_151 {dimension_numbers = #tpu.dot_dimension_numbers<[1], [1], [0], [0], [0, 0, 1, 0], [], []>} : vector<5x8xbf16>, vector<5x8xbf16>, vector<5x5xf32> -> vector<5x5xf32>
    %cst_152 = arith.constant 0.353553385 : f32
    %465 = vector.broadcast %cst_152 : f32 to vector<5x5xf32>
    %466 = arith.mulf %464, %465 : vector<5x5xf32>
    %cst_153 = arith.constant dense<0xFF800000> : vector<5xf32>
    %467 = vector.multi_reduction <maximumf>, %466, %cst_153 [1] : vector<5x5xf32> to vector<5xf32>
    %468 = vector.shape_cast %467 : vector<5xf32> to vector<5x1xf32>
    %469 = vector.broadcast %468 : vector<5x1xf32> to vector<5x5xf32>
    %470 = arith.subf %466, %469 : vector<5x5xf32>
    %471 = math.exp %470 : vector<5x5xf32>
    %cst_154 = arith.constant dense<0.000000e+00> : vector<5xf32>
    %472 = vector.multi_reduction <add>, %471, %cst_154 [1] : vector<5x5xf32> to vector<5xf32>
    %473 = vector.shape_cast %472 : vector<5xf32> to vector<5x1xf32>
    %474 = tpu.reciprocal %473 {approx = true} : vector<5x1xf32> -> vector<5x1xf32>
    %475 = vector.broadcast %474 : vector<5x1xf32> to vector<5x5xf32>
    %476 = arith.mulf %471, %475 : vector<5x5xf32>
    %477 = arith.truncf %476 : vector<5x5xf32> to vector<5x5xbf16>
    %cst_155 = arith.constant dense<0.000000e+00> : vector<5x8xf32>
    %478 = tpu.matmul %477, %463, %cst_155 {dimension_numbers = #tpu.dot_dimension_numbers<[1], [0], [0], [1], [0, 0, 1, 1], [], []>} : vector<5x5xbf16>, vector<5x8xbf16>, vector<5x8xf32> -> vector<5x8xf32>
    %479 = tpu.concatenate %415, %436, %457, %478 in 1 : vector<5x8xf32>, vector<5x8xf32>, vector<5x8xf32>, vector<5x8xf32> -> vector<5x32xf32>
    %480 = tpu.concatenate %394, %479 in 0 : vector<5x32xf32>, vector<5x32xf32> -> vector<10x32xf32>
    %481 = arith.truncf %480 : vector<10x32xf32> to vector<10x32xbf16>
    %c1_156 = arith.constant 1 : index
    %c0_157 = arith.constant 0 : index
    %c0_158 = arith.constant 0 : index
    %482 = vector.load %arg7[%c1_156, %c0_157, %c0_158] : memref<2x32x32xbf16, #tpu.memory_space<vmem>>, vector<1x32x32xbf16>
    %483 = vector.shape_cast %482 : vector<1x32x32xbf16> to vector<32x32xbf16>
    %cst_159 = arith.constant dense<0.000000e+00> : vector<10x32xf32>
    %484 = tpu.matmul %481, %483, %cst_159 {dimension_numbers = #tpu.dot_dimension_numbers<[1], [0], [0], [1], [0, 0, 1, 1], [], []>} : vector<10x32xbf16>, vector<32x32xbf16>, vector<10x32xf32> -> vector<10x32xf32>
    %485 = arith.addf %275, %484 : vector<10x32xf32>
    %c1_160 = arith.constant 1 : index
    %c0_161 = arith.constant 0 : index
    %c0_162 = arith.constant 0 : index
    %486 = vector.load %arg8[%c1_160, %c0_161, %c0_162] : memref<2x1x32xf32, #tpu.memory_space<vmem>>, vector<1x1x32xf32>
    %487 = vector.shape_cast %486 : vector<1x1x32xf32> to vector<1x32xf32>
    %488 = vector.broadcast %487 : vector<1x32xf32> to vector<10x32xf32>
    %489 = arith.addf %485, %488 : vector<10x32xf32>
    %c1_163 = arith.constant 1 : index
    %c0_164 = arith.constant 0 : index
    %c0_165 = arith.constant 0 : index
    %490 = vector.load %arg9[%c1_163, %c0_164, %c0_165] : memref<2x1x32xf32, #tpu.memory_space<vmem>>, vector<1x1x32xf32>
    %491 = vector.shape_cast %490 : vector<1x1x32xf32> to vector<1x32xf32>
    %c1_166 = arith.constant 1 : index
    %c0_167 = arith.constant 0 : index
    %c0_168 = arith.constant 0 : index
    %492 = vector.load %arg10[%c1_166, %c0_167, %c0_168] : memref<2x1x32xf32, #tpu.memory_space<vmem>>, vector<1x1x32xf32>
    %493 = vector.shape_cast %492 : vector<1x1x32xf32> to vector<1x32xf32>
    %cst_169 = arith.constant dense<0.000000e+00> : vector<10xf32>
    %494 = vector.multi_reduction <add>, %489, %cst_169 [1] : vector<10x32xf32> to vector<10xf32>
    %495 = vector.shape_cast %494 : vector<10xf32> to vector<10x1xf32>
    %cst_170 = arith.constant 3.200000e+01 : f32
    %496 = vector.broadcast %cst_170 : f32 to vector<10x1xf32>
    %497 = arith.divf %495, %496 : vector<10x1xf32>
    %498 = vector.broadcast %497 : vector<10x1xf32> to vector<10x32xf32>
    %499 = arith.subf %489, %498 : vector<10x32xf32>
    %500 = arith.mulf %499, %499 : vector<10x32xf32>
    %cst_171 = arith.constant dense<0.000000e+00> : vector<10xf32>
    %501 = vector.multi_reduction <add>, %500, %cst_171 [1] : vector<10x32xf32> to vector<10xf32>
    %502 = vector.shape_cast %501 : vector<10xf32> to vector<10x1xf32>
    %cst_172 = arith.constant 3.200000e+01 : f32
    %503 = vector.broadcast %cst_172 : f32 to vector<10x1xf32>
    %504 = arith.divf %502, %503 : vector<10x1xf32>
    %505 = vector.broadcast %497 : vector<10x1xf32> to vector<10x32xf32>
    %506 = arith.subf %489, %505 : vector<10x32xf32>
    %cst_173 = arith.constant 9.99999974E-6 : f32
    %507 = vector.broadcast %cst_173 : f32 to vector<10x1xf32>
    %508 = arith.addf %504, %507 : vector<10x1xf32>
    %509 = math.rsqrt %508 : vector<10x1xf32>
    %510 = vector.broadcast %509 : vector<10x1xf32> to vector<10x32xf32>
    %511 = arith.mulf %506, %510 : vector<10x32xf32>
    %512 = vector.broadcast %491 : vector<1x32xf32> to vector<10x32xf32>
    %513 = arith.mulf %511, %512 : vector<10x32xf32>
    %514 = vector.broadcast %493 : vector<1x32xf32> to vector<10x32xf32>
    %515 = arith.addf %513, %514 : vector<10x32xf32>
    %516 = arith.truncf %515 : vector<10x32xf32> to vector<10x32xbf16>
    %c1_174 = arith.constant 1 : index
    %c0_175 = arith.constant 0 : index
    %c0_176 = arith.constant 0 : index
    %517 = vector.load %arg11[%c1_174, %c0_175, %c0_176] : memref<2x32x64xbf16, #tpu.memory_space<vmem>>, vector<1x32x64xbf16>
    %518 = vector.shape_cast %517 : vector<1x32x64xbf16> to vector<32x64xbf16>
    %cst_177 = arith.constant dense<0.000000e+00> : vector<10x64xf32>
    %519 = tpu.matmul %516, %518, %cst_177 {dimension_numbers = #tpu.dot_dimension_numbers<[1], [0], [0], [1], [0, 0, 1, 1], [], []>} : vector<10x32xbf16>, vector<32x64xbf16>, vector<10x64xf32> -> vector<10x64xf32>
    %c1_178 = arith.constant 1 : index
    %c0_179 = arith.constant 0 : index
    %c0_180 = arith.constant 0 : index
    %520 = vector.load %arg12[%c1_178, %c0_179, %c0_180] : memref<2x1x64xf32, #tpu.memory_space<vmem>>, vector<1x1x64xf32>
    %521 = vector.shape_cast %520 : vector<1x1x64xf32> to vector<1x64xf32>
    %522 = vector.broadcast %521 : vector<1x64xf32> to vector<10x64xf32>
    %523 = arith.addf %519, %522 : vector<10x64xf32>
    %524 = arith.mulf %523, %523 : vector<10x64xf32>
    %525 = arith.mulf %523, %524 : vector<10x64xf32>
    %cst_181 = arith.constant 4.471500e-02 : f32
    %526 = vector.broadcast %cst_181 : f32 to vector<10x64xf32>
    %527 = arith.mulf %526, %525 : vector<10x64xf32>
    %528 = arith.addf %523, %527 : vector<10x64xf32>
    %cst_182 = arith.constant 0.797884583 : f32
    %529 = vector.broadcast %cst_182 : f32 to vector<10x64xf32>
    %530 = arith.mulf %529, %528 : vector<10x64xf32>
    %531 = math.tanh %530 : vector<10x64xf32>
    %cst_183 = arith.constant 1.000000e+00 : f32
    %532 = vector.broadcast %cst_183 : f32 to vector<10x64xf32>
    %533 = arith.addf %532, %531 : vector<10x64xf32>
    %cst_184 = arith.constant 5.000000e-01 : f32
    %534 = vector.broadcast %cst_184 : f32 to vector<10x64xf32>
    %535 = arith.mulf %534, %533 : vector<10x64xf32>
    %536 = arith.mulf %523, %535 : vector<10x64xf32>
    %537 = arith.truncf %536 : vector<10x64xf32> to vector<10x64xbf16>
    %c1_185 = arith.constant 1 : index
    %c0_186 = arith.constant 0 : index
    %c0_187 = arith.constant 0 : index
    %538 = vector.load %arg13[%c1_185, %c0_186, %c0_187] : memref<2x64x32xbf16, #tpu.memory_space<vmem>>, vector<1x64x32xbf16>
    %539 = vector.shape_cast %538 : vector<1x64x32xbf16> to vector<64x32xbf16>
    %cst_188 = arith.constant dense<0.000000e+00> : vector<10x32xf32>
    %540 = tpu.matmul %537, %539, %cst_188 {dimension_numbers = #tpu.dot_dimension_numbers<[1], [0], [0], [1], [0, 0, 1, 1], [], []>} : vector<10x64xbf16>, vector<64x32xbf16>, vector<10x32xf32> -> vector<10x32xf32>
    %541 = arith.addf %489, %540 : vector<10x32xf32>
    %c1_189 = arith.constant 1 : index
    %c0_190 = arith.constant 0 : index
    %c0_191 = arith.constant 0 : index
    %542 = vector.load %arg14[%c1_189, %c0_190, %c0_191] : memref<2x1x32xf32, #tpu.memory_space<vmem>>, vector<1x1x32xf32>
    %543 = vector.shape_cast %542 : vector<1x1x32xf32> to vector<1x32xf32>
    %544 = vector.broadcast %543 : vector<1x32xf32> to vector<10x32xf32>
    %545 = arith.addf %541, %544 : vector<10x32xf32>
    %c0_192 = arith.constant 0 : index
    %c0_193 = arith.constant 0 : index
    %546 = vector.load %arg15[%c0_192, %c0_193] : memref<10x32xf32, #tpu.memory_space<vmem>>, vector<10x32xf32>
    tpu.vector_store %arg15[%c0_192, %c0_193], %545 {strides = array<i32>} : memref<10x32xf32, #tpu.memory_space<vmem>>, vector<10x32xf32>,
    return
  }
}

</mosaic_0001>

<bundles_post_ra>
// kernel: tile.9
= control target key start
LH: loop header
LB: loop body
LE: loop exit
PB: predicated region body
PF: predicated region fallthrough
CT: control target
= control target key end

     0   :  { %vm3_vm0 = vcmask 261120   ;;  %s34_s0 = inlined_call_operand.vmem [shape: f32[2,5,32], index: 0, kind: input, shape index: {}]   ;;  %s35_s1 = inlined_call_operand.vmem [shape: f32[10,32], index: 1, kind: output, shape index: {}]  }
   0x1   :  { %v2_v0 = vld [vmem:[%s34_s0] sm:$0x1f]   ;;  %v10_v1 = vld [vmem:[%s34_s0 + $0x8] sm:$0x1f]  }
   0x2   :  { %4 = vst.msk [vmem:[%s35_s1] sm:$0x1f] %vm3_vm0, %v2_v0  }
   0x3   :  { %11 = vst.msk [vmem:[%s35_s1 + $0x5] sm:$0x1f] %vm3_vm0, %v10_v1  }

// kernel: _blip2_vision_forward.1
= control target key start
LH: loop header
LB: loop body
LE: loop exit
PB: predicated region body
PF: predicated region fallthrough
CT: control target
= control target key end

     0   :  { %vm155_vm0 = vcmask 523264   ;;  %vm189_vm1 = vcmask 261120   ;;  %vm193_vm2 = vcmask 254976   ;;  %v2211_v30 = vmov 32.0   ;;  %s2212_s16 = smov 88   ;;  %s2834_s17 = smov 64   ;;  %s2813_s1 = inlined_call_operand.vmem [shape: bf16[192,32], index: 1, kind: input, shape index: {}]   ;;  %s2814_s0 = inlined_call_operand.vmem [shape: f32[10,192], index: 0, kind: input, shape index: {}]   ;;  %s2815_s2 = inlined_call_operand.vmem [shape: f32[10,32], index: 2, kind: input, shape index: {}]   ;;  %s2816_s3 = inlined_call_operand.vmem [shape: f32[2,1,32], index: 3, kind: input, shape index: {}]   ;;  %s2817_s4 = inlined_call_operand.vmem [shape: f32[2,1,32], index: 4, kind: input, shape index: {}]   ;;  %s2818_s6 = inlined_call_operand.vmem [shape: f32[2,1,96], index: 6, kind: input, shape index: {}]   ;;  %s2819_s5 = inlined_call_operand.vmem [shape: bf16[2,32,96], index: 5, kind: input, shape index: {}]   ;;  %s2820_s8 = inlined_call_operand.vmem [shape: f32[2,1,32], index: 8, kind: input, shape index: {}]   ;;  %s2821_s7 = inlined_call_operand.vmem [shape: bf16[2,32,32], index: 7, kind: input, shape index: {}]   ;;  %s2822_s9 = inlined_call_operand.vmem [shape: f32[2,1,32], index: 9, kind: input, shape index: {}]   ;;  %s2823_s10 = inlined_call_operand.vmem [shape: f32[2,1,32], index: 10, kind: input, shape index: {}]   ;;  %s2824_s12 = inlined_call_operand.vmem [shape: f32[2,1,64], index: 12, kind: input, shape index: {}]   ;;  %s2825_s11 = inlined_call_operand.vmem [shape: bf16[2,32,64], index: 11, kind: input, shape index: {}]   ;;  %s2826_s14 = inlined_call_operand.vmem [shape: f32[2,1,32], index: 14, kind: input, shape index: {}]   ;;  %s2827_s13 = inlined_call_operand.vmem [shape: bf16[2,64,32], index: 13, kind: input, shape index: {}]   ;;  %s2828_s15 = inlined_call_operand.vmem [shape: f32[10,32], index: 15, kind: output, shape index: {}]  }
   0x1   :  { %v2034_v0 = vld [vmem:[%s2813_s1 + $0x38] sm:$0xff]  ;;  %v2033_v2 = vld [vmem:[%s2813_s1 + $0x30] sm:$0xff]  ;;  %v2032_v4 = vld [vmem:[%s2813_s1 + $0x28] sm:$0xff]  ;;  %2121 = vrcp.f32 %v2211_v30  ;;  %s2214_s18 = smov 96   ;;  %s2215_s19 = smov 80   ;;  %vm294_vm10 = vcmask 64512  }
   0x2   :  { %v2038_v1 = vld [vmem:[%s2813_s1 + $0x58] sm:$0xff]  ;;  %159 = vmatpush.bf16.msra.mxu0 %v2034_v0  ;;  %v2037_v3 = vld [vmem:[%s2813_s1 + $0x50] sm:$0xff]  ;;  %v2036_v5 = vld [vmem:[%s2813_s1 + $0x48] sm:$0xff]  ;;  %s2216_s20 = smov 120   ;;  %s2217_s21 = smov 112   ;;  %vm334_vm11 = vcmask 1041408  }
   0x3   :  { %177 = vmatpush.bf16.msra.mxu1 %v2038_v1  ;;  %v2031_v6 = vld [vmem:[%s2813_s1 + $0x20] sm:$0xff]  ;;  %v52_v8 = vld [vmem:[%s2814_s0 + $0x8] sm:$0xff]  ;;  %v54_v9 = vld [vmem:[%s2814_s0 + $0x18] sm:$0x3]  ;;  %vm335_vm12 = vcmask 1042432   ;;  %v2219_v30 = vmov 65535  }
   0x4   :  { %v2035_v7 = vld [vmem:[%s2813_s1 + $0x40] sm:$0xff]  ;;  %v2030_v10 = vld [vmem:[%s2813_s1 + $0x18] sm:$0xff]  ;;  %v56_v11 = vpack.c.bf16 %v54_v9, %v52_v8  ;;  %v2029_v12 = vld [vmem:[%s2813_s1 + $0x10] sm:$0xff]  ;;  %vm315_vm13 = vcmask 36864   ;;  %s2220_s22 = smov 72   ;;  %vm330_vm14 = vcmask 39936  }
   0x5   :  { %v2028_v13 = vld [vmem:[%s2813_s1 + $0x8] sm:$0xff]  ;;  %v2027_v14 = vld [vmem:[%s2813_s1] sm:$0xff]  ;;  %v53_v16 = vld [vmem:[%s2814_s0 + $0x10] sm:$0x3]  ;;  %s2218_s1 = smov 104   ;;  %s2836_s23 = smov 48  }
   0x6   :  { %160 = vmatpush.bf16.msra.mxu0 %v2033_v2  ;;  %v51_v15 = vld [vmem:[%s2814_s0] sm:$0xff]  ;;  %v82_v24 = vld [vmem:[%s2815_s2 + $0x8] sm:$0x3]  ;;  %s2221_s0 = smov 56   ;;  %s2831_s24 = smov 8   ;;  %vm538_vm15 = vcmask 130048  }
   0x7   :  { %178 = vmatpush.bf16.msra.mxu1 %v2037_v3  ;;  %v55_v17 = vpack.c.bf16 %v53_v16, %v51_v15  ;;  %v81_v18 = vld [vmem:[%s2815_s2] sm:$0xff]  ;;  %v2122_v31 = vpop.eup %2121  ;;  %v2040_v47 = vld [vmem:[%s2819_s5 + $0x8] sm:$0xff]  ;;  %s2832_s2 = smov 40   ;;  %s2830_s25 = smov 24  }
   0x8   :  { %v198_v32 = vmul.f32 32.0, %v2122_v31  ;;  %vm202_vm3 = vweird.f32 %v2122_v31  ;;  %282 = vmatpush.bf16.msra.mxu2 %v2040_v47  ;;  %v2039_v49 = vld [vmem:[%s2819_s5] sm:$0xff]  ;;  %s2829_s26 = smov 16  }
   0x9   :  { %v2106_v9 = vld [vmem:[%s2817_s4] ss:$0 sm:$0xff] }
   0xa   :  { %161 = vmatpush.bf16.msra.mxu0 %v2032_v4  ;;  %v199_v33 = vsub.f32 1.0, %v198_v32  ;;  %v2105_v4 = vld [vmem:[%s2816_s3] ss:$0 sm:$0xff] }
   0xb   :  { %179 = vmatpush.bf16.msra.mxu1 %v2036_v5 }
   0xc   :  { %v200_v34 = vmul.f32 %v2122_v31, %v199_v33  ;;  %283 = vmatpush.bf16.msra.mxu2 %v2039_v49 }
   0xe   :  { %162 = vmatpush.bf16.msra.mxu0 %v2031_v6  ;;  %v201_v35 = vadd.f32 %v2122_v31, %v200_v34 }
   0xf   :  { %180 = vmatpush.bf16.msra.mxu1 %v2035_v7 }
  0x10   :  { %v2370_v36 = vsel %vm202_vm3, %v2122_v31, %v201_v35  ;;  %v336_v31 = vsel %vm334_vm11, 4294967295, %v2219_v30  ;;  %vm540_vm3 = vcmask 195584  }
  0x11   :  { %v2421_v32 = vsel %vm335_vm12, %v336_v31, 0 }
  0x12   :  { %163 = vmatpush.bf16.msra.mxu0 %v2030_v10  ;;  %1878 = vmatmul.msk.bf16.vlgmr.msra.gmra.mxu1 %vm155_vm0, %v56_v11 }
  0x16   :  { %164 = vmatpush.bf16.msra.mxu0 %v2029_v12 }
  0x1a   :  { %165 = vmatpush.bf16.msra.mxu0 %v2028_v13 }
  0x1e   :  { %166 = vmatpush.bf16.msra.mxu0 %v2027_v14  ;;  %v2109_v14 = vld [vmem:[%s2818_s6] ss:$0 sm:$0xff] }
  0x21   :  { %167 = vmatmul.bf16.vlgmr.msra.gmra.mxu0 %v55_v17 }
  0x8f   :  { %v182_v19 = vpop.f32.mrf.mxu1 }
  0x97   :  { %v184_v27 = vpop.f32.mrf.mxu1 }
  0x9e   :  { %v168_v20 = vpop.f32.mrf.mxu0 }
  0x9f   :  { %v169_v21 = vadd.f32 %v168_v20, %v81_v18 }
  0xa1   :  { %v2359_v22 = vadd.f32 %v182_v19, %v169_v21 }
  0xa3   :  { %v190_v23 = vsel %vm189_vm1, %v2359_v22, 0.0 }
  0xa4   :  { %191 = vadd.xlane.f32.xlu0 %v190_v23 }
  0xa6   :  { %v170_v25 = vpop.f32.mrf.mxu0 }
  0xa7   :  { %v171_v26 = vadd.f32 %v170_v25, %v82_v24 }
  0xa9   :  { %v2366_v28 = vadd.f32 %v184_v27, %v171_v26 }
  0xab   :  { %v194_v29 = vsel %vm193_vm2, %v2366_v28, 0.0 }
  0xac   :  { %195 = vadd.xlane.f32.xlu0 %v194_v29 }
 0x117   :  { %v192_v37 = vpop.xlane.xlu0 %191 }
 0x118   :  { %v204_v38 = vmul.f32 %v2370_v36, %v192_v37 }
 0x11a   :  { %v206_v39 = vsub.f32 %v2359_v22, %v204_v38 }
 0x11c   :  { %v208_v40 = vmul.f32 %v206_v39, %v206_v39 }
 0x11e   :  { %v210_v41 = vsel %vm189_vm1, %v208_v40, 0.0 }
 0x11f   :  { %211 = vadd.xlane.f32.xlu1 %v210_v41  ;;  %v196_v42 = vpop.xlane.xlu0 %195 }
 0x120   :  { %v205_v43 = vmul.f32 %v2370_v36, %v196_v42 }
 0x122   :  { %v207_v44 = vsub.f32 %v2366_v28, %v205_v43 }
 0x124   :  { %v209_v45 = vmul.f32 %v207_v44, %v207_v44 }
 0x126   :  { %v213_v46 = vsel %vm193_vm2, %v209_v45, 0.0 }
 0x127   :  { %214 = vadd.xlane.f32.xlu1 %v213_v46 }
 0x192   :  { %v212_v48 = vpop.xlane.xlu1 %211 }
 0x193   :  { %v216_v50 = vmul.f32 %v212_v48, %v2370_v36 }
 0x195   :  { %v218_v51 = vadd.f32 1e-05, %v216_v50 }
 0x197   :  { %2123 = vrsqrt.f32 %v218_v51  ;;  %vm226_vm5 = vweird.f32 %v218_v51 }
 0x19a   :  { %v215_v52 = vpop.xlane.xlu1 %214 }
 0x19b   :  { %v217_v53 = vmul.f32 %v215_v52, %v2370_v36 }
 0x19d   :  { %v2124_v54 = vpop.eup %2123  ;;  %v219_v55 = vadd.f32 1e-05, %v217_v53 }
 0x19e   :  { %v221_v56 = vmul.f32 %v2124_v54, %v218_v51  ;;  %vm227_vm4 = vweird.f32 %v2124_v54 }
 0x19f   :  { %2125 = vrsqrt.f32 %v219_v55  ;;  %vm228_vm6 = vmor %vm226_vm5, %vm227_vm4  ;;  %vm236_vm8 = vweird.f32 %v219_v55  ;;  %vm795_vm4 = vcmask 1044480  }
 0x1a0   :  { %v222_v57 = vmul.f32 %v2124_v54, %v221_v56 }
 0x1a2   :  { %v223_v58 = vmul.f32 0.5, %v222_v57 }
 0x1a4   :  { %v224_v59 = vsub.f32 1.5, %v223_v58 }
 0x1a5   :  { %v2126_v60 = vpop.eup %2125 }
 0x1a6   :  { %v225_v61 = vmul.f32 %v2124_v54, %v224_v59  ;;  %v231_v62 = vmul.f32 %v2126_v60, %v219_v55  ;;  %vm237_vm7 = vweird.f32 %v2126_v60 }
 0x1a7   :  { %vm238_vm9 = vmor %vm236_vm8, %vm237_vm7 }
 0x1a8   :  { %v232_v63 = vmul.f32 %v2126_v60, %v231_v62  ;;  %v229_v0 = vsel %vm228_vm6, %v2124_v54, %v225_v61 }
 0x1a9   :  { %v240_v3 = vmul.f32 %v229_v0, %v206_v39 }
 0x1aa   :  { %v233_v1 = vmul.f32 0.5, %v232_v63 }
 0x1ab   :  { %v245_v8 = vmul.f32 %v2105_v4, %v240_v3 }
 0x1ac   :  { %v234_v2 = vsub.f32 1.5, %v233_v1 }
 0x1ad   :  { %v250_v11 = vadd.f32 %v2106_v9, %v245_v8 }
 0x1ae   :  { %v235_v5 = vmul.f32 %v2126_v60, %v234_v2 }
 0x1b0   :  { %v239_v6 = vsel %vm238_vm9, %v2126_v60, %v235_v5 }
 0x1b1   :  { %v241_v7 = vmul.f32 %v239_v6, %v207_v44 }
 0x1b3   :  { %v246_v10 = vmul.f32 %v2105_v4, %v241_v7 }
 0x1b5   :  { %v251_v12 = vadd.f32 %v2106_v9, %v246_v10 }
 0x1b7   :  { %v252_v13 = vpack.c.bf16 %v251_v12, %v250_v11 }
 0x1b9   :  { %1887 = vmatmul.msk.bf16.vlgmr.msra.gmra.mxu2 %vm189_vm1, %v252_v13 }
 0x23c   :  { %v285_v15 = vpop.f32.mrf.mxu2 }
 0x23d   :  { %v286_v16 = vadd.f32 %v2109_v14, %v285_v15 }
 0x23f   :  { %v2396_v17 = vpack.c.bf16 %v286_v16, %v286_v16 }
 0x241   :  { %356 = vrot.lane.b32.xlu0 %v2396_v17, %s2212_s16  ;;  %328 = vrot.lane.b32.xlu1 %v2396_v17, %s2834_s17 }
 0x242   :  { %292 = vrot.lane.b32.xlu2 %v2396_v17, %s2214_s18 }
 0x244   :  { %v287_v18 = vpop.f32.mrf.mxu2 }
 0x245   :  { %v288_v19 = vadd.f32 %v2109_v14, %v287_v18 }
 0x247   :  { %v542_v20 = vpack.c.bf16 %v288_v19, %v286_v16 }
 0x249   :  { %413 = vrot.lane.b32.xlu0 %v2396_v17, %s2215_s19  ;;  %354 = vrot.lane.b32.xlu1 %v2396_v17, %s2216_s20  ;;  %v544_v21 = vshrl.u32 %v542_v20, 16  ;;  %v547_v23 = vshll.u32 %v542_v20, 16 }
 0x24b   :  { %v546_v24 = vrot.slane %v544_v21, 2  ;;  %v549_v25 = vrot.slane %v547_v23, 3 }
 0x24d   :  { %v2412_v26 = vor.u32 %v549_v25, %v546_v24 }
 0x251   :  { %411 = vrot.lane.b32.xlu1 %v2396_v17, %s2217_s21 }
 0x259   :  { %468 = vrot.lane.b32.xlu1 %v2396_v17, %s2218_s1 }
 0x261   :  { %665 = vrot.lane.b32.xlu1 %v2412_v26, %s2215_s19 }
 0x269   :  { %663 = vrot.lane.b32.xlu1 %v2412_v26, %s2217_s21 }
 0x29c   :  { %v293_v27 = vpop.permute.xlu2 %292 }
 0x29d   :  { %v299_v29 = vsel %vm294_vm10, %v293_v27, 0 }
 0x29e   :  { %308 = vmatpush.bf16.xpose.msra.mxu3 %v299_v29 }
 0x2a5   :  { %1888 = vmatmul.msk.bf16.vlgmr.msra.gmra.mxu3 %vm294_vm10, %v2396_v17 }
 0x2b3   :  { %v357_v33 = vpop.permute.xlu0 %356  ;;  %v329_v34 = vpop.permute.xlu1 %328 }
 0x2b4   :  { %v339_v35 = vand.u32 %v2421_v32, %v329_v34  ;;  %v362_v37 = vsel %vm294_vm10, %v357_v33, 0 }
 0x2b5   :  { %371 = vmatpush.bf16.xpose.msrb.mxu3 %v362_v37 }
 0x2b6   :  { %348 = vmatpush.bf16.msrb.mxu2 %v339_v35 }
 0x2bb   :  { %v414_v38 = vpop.permute.xlu0 %413  ;;  %v355_v39 = vpop.permute.xlu1 %354 }
 0x2bc   :  { %v419_v40 = vsel %vm294_vm10, %v414_v38, 0  ;;  %1890 = vmatmul.msk.bf16.vlgmr.msrb.gmra.mxu3 %vm294_vm10, %v355_v39 }
 0x2bd   :  { %428 = vmatpush.bf16.xpose.msra.mxu2 %v419_v40 }
 0x2c3   :  { %v412_v52 = vpop.permute.xlu1 %411 }
 0x2cb   :  { %v469_v57 = vpop.permute.xlu1 %468 }
 0x2d3   :  { %v666_v4 = vpop.permute.xlu1 %665 }
 0x2d4   :  { %v671_v7 = vsel %vm294_vm10, %v666_v4, 0 }
 0x2db   :  { %v664_v12 = vpop.permute.xlu1 %663 }
 0x328   :  { %v310_v41 = vpop.f32.mrf.mxu3 }
 0x329   :  { %v314_v42 = vmul.f32 0.35355338, %v310_v41 }
 0x32b   :  { %v316_v43 = vsel %vm315_vm13, %v314_v42, -inf }
 0x32c   :  { %317 = vmax.xlane.f32.xlu2 %v316_v43 }
 0x330   :  { %v312_v44 = vpop.f32.mrf.mxu3 }
 0x33f   :  { %v373_v45 = vpop.f32.mrf.mxu3 }
 0x340   :  { %v2428_v46 = vmul.f32 0.35355338, %v373_v45 }
 0x342   :  { %v378_v47 = vsel %vm315_vm13, %v2428_v46, -inf }
 0x343   :  { %379 = vmax.xlane.f32.xlu1 %v378_v47 }
 0x344   :  { %470 = vrot.lane.b32.xlu2 %v2396_v17, %s2220_s22 }
 0x347   :  { %v375_v48 = vpop.f32.mrf.mxu3 }
 0x34c   :  { %722 = vrot.lane.b32.xlu2 %v2412_v26, %s2220_s22 }
 0x39f   :  { %v318_v49 = vpop.xlane.xlu2 %317 }
 0x3a0   :  { %v319_v50 = vsub.f32 %v314_v42, %v318_v49 }
 0x3a2   :  { %v320_v51 = vmul.f32 1.442695, %v319_v50 }
 0x3a4   :  { %2127 = vpow2.f32 %v320_v51 }
 0x3a7   :  { %v471_v53 = vpop.permute.xlu2 %470 }
 0x3a8   :  { %v476_v54 = vsel %vm294_vm10, %v471_v53, 0 }
 0x3a9   :  { %485 = vmatpush.bf16.xpose.msrb.mxu0 %v476_v54 }
 0x3aa   :  { %v2128_v55 = vpop.eup %2127 }
 0x3ab   :  { %v322_v56 = vsel %vm315_vm13, %v2128_v55, 0.0 }
 0x3ac   :  { %323 = vadd.xlane.f32.xlu0 %v322_v56 }
 0x3af   :  { %v723_v5 = vpop.permute.xlu2 %722 }
 0x3b0   :  { %1894 = vmatmul.msk.bf16.vlgmr.msrb.gmra.mxu0 %vm294_vm10, %v469_v57  ;;  %v728_v9 = vsel %vm294_vm10, %v723_v5, 0 }
 0x3b6   :  { %v380_v16 = vpop.xlane.xlu1 %379 }
 0x3b7   :  { %v381_v20 = vsub.f32 %v2428_v46, %v380_v16 }
 0x3b9   :  { %v382_v21 = vmul.f32 1.442695, %v381_v20 }
 0x3c0   :  { %551 = vrot.lane.b32.xlu0 %v2412_v26, %s2214_s18 }
 0x3c8   :  { %608 = vrot.lane.b32.xlu0 %v2412_v26, %s2212_s16 }
 0x3d0   :  { %606 = vrot.lane.b32.xlu0 %v2412_v26, %s2216_s20 }
 0x3d8   :  { %720 = vrot.lane.b32.xlu0 %v2412_v26, %s2218_s1 }
 0x41f   :  { %v324_v58 = vpop.xlane.xlu0 %323 }
 0x420   :  { %2129 = vrcp.f32 %v324_v58 }
 0x421   :  { %2131 = vpow2.f32 %v382_v21 }
 0x426   :  { %v2130_v59 = vpop.eup %2129 }
 0x427   :  { %v326_v60 = vmul.f32 %v2130_v59, %v2128_v55  ;;  %v2132_v35 = vpop.eup %2131 }
 0x428   :  { %v384_v38 = vsel %vm315_vm13, %v2132_v35, 0.0 }
 0x429   :  { %v327_v61 = vpack.c.bf16 %v326_v60, %v326_v60 }
 0x42b   :  { %1889 = vmatmul.msk.bf16.vlgmr.msrb.gmra.mxu2 %vm330_vm14, %v327_v61 }
 0x42d   :  { %v487_v62 = vpop.f32.mrf.mxu0 }
 0x42e   :  { %v491_v63 = vmul.f32 0.35355338, %v487_v62 }
 0x430   :  { %v492_v0 = vsel %vm315_vm13, %v491_v63, -inf }
 0x431   :  { %493 = vmax.xlane.f32.xlu0 %v492_v0 }
 0x432   :  { %v552_v1 = vpop.permute.xlu0 %551 }
 0x433   :  { %v557_v2 = vsel %vm294_vm10, %v552_v1, 0 }
 0x434   :  { %566 = vmatpush.bf16.xpose.msrb.mxu2 %v557_v2 }
 0x435   :  { %v489_v3 = vpop.f32.mrf.mxu0 }
 0x43a   :  { %v609_v6 = vpop.permute.xlu0 %608 }
 0x43b   :  { %v614_v8 = vsel %vm294_vm10, %v609_v6, 0  ;;  %1892 = vmatmul.msk.bf16.vlgmr.msra.gmra.mxu2 %vm294_vm10, %v412_v52 }
 0x43c   :  { %680 = vmatpush.bf16.xpose.msra.mxu2 %v671_v7  ;;  %623 = vmatpush.bf16.xpose.msra.mxu0 %v614_v8 }
 0x442   :  { %v607_v10 = vpop.permute.xlu0 %606 }
 0x443   :  { %1898 = vmatmul.msk.bf16.vlgmr.msra.gmra.mxu0 %vm294_vm10, %v607_v10 }
 0x444   :  { %737 = vmatpush.bf16.xpose.msrb.mxu0 %v728_v9 }
 0x445   :  { %390 = vrot.lane.b32.xlu0 %v2396_v17, %s2221_s0 }
 0x44a   :  { %v721_v11 = vpop.permute.xlu0 %720 }
 0x44b   :  { %1896 = vmatmul.msk.bf16.vlgmr.msrb.gmra.mxu2 %vm294_vm10, %v2412_v26 }
 0x44d   :  { %504 = vrot.lane.b32.xlu0 %v2396_v17, %s2832_s2 }
 0x453   :  { %1902 = vmatmul.msk.bf16.vlgmr.msrb.gmra.mxu0 %vm294_vm10, %v721_v11 }
 0x45b   :  { %1900 = vmatmul.msk.bf16.vlgmr.msra.gmra.mxu2 %vm294_vm10, %v664_v12 }
 0x4a4   :  { %v494_v14 = vpop.xlane.xlu0 %493 }
 0x4a5   :  { %v495_v41 = vsub.f32 %v491_v63, %v494_v14 }
 0x4a7   :  { %v496_v44 = vmul.f32 1.442695, %v495_v41 }
 0x4a9   :  { %2133 = vpow2.f32 %v496_v44 }
 0x4ae   :  { %v2463_v13 = vpop.f32.mrf.mxu2 }
 0x4af   :  { %v2134_v49 = vpop.eup %2133 }
 0x4b0   :  { %v498_v53 = vsel %vm315_vm13, %v2134_v49, 0.0 }
 0x4b6   :  { %v352_v15 = vpop.f32.mrf.mxu2 }
 0x4b7   :  { %v391_v18 = vpop.permute.xlu0 %390 }
 0x4b8   :  { %v396_v19 = vand.u32 %v391_v18, %v2421_v32 }
 0x4ba   :  { %405 = vmatpush.bf16.msrb.mxu1 %v396_v19 }
 0x4be   :  { %v430_v23 = vpop.f32.mrf.mxu2 }
 0x4bf   :  { %v434_v24 = vmul.f32 0.35355338, %v430_v23  ;;  %v505_v25 = vpop.permute.xlu0 %504 }
 0x4c0   :  { %v510_v27 = vand.u32 %v505_v25, %v2421_v32  ;;  %v625_v29 = vpop.f32.mrf.mxu0 }
 0x4c1   :  { %v629_v30 = vmul.f32 0.35355338, %v625_v29  ;;  %v435_v31 = vsel %vm315_vm13, %v434_v24, -inf }
 0x4c2   :  { %436 = vmax.xlane.f32.xlu2 %v435_v31  ;;  %519 = vmatpush.bf16.msra.mxu1 %v510_v27 }
 0x4c3   :  { %v630_v33 = vsel %vm315_vm13, %v629_v30, -inf }
 0x4c4   :  { %631 = vmax.xlane.f32.xlu1 %v630_v33 }
 0x4c6   :  { %v432_v34 = vpop.f32.mrf.mxu2 }
 0x4c8   :  { %v627_v37 = vpop.f32.mrf.mxu0 }
 0x4cc   :  { %385 = vadd.xlane.f32.xlu1 %v384_v38 }
 0x4ce   :  { %v568_v39 = vpop.f32.mrf.mxu2 }
 0x4cf   :  { %v572_v40 = vmul.f32 0.35355338, %v568_v39 }
 0x4d0   :  { %v739_v42 = vpop.f32.mrf.mxu0 }
 0x4d1   :  { %v573_v43 = vsel %vm315_vm13, %v572_v40, -inf  ;;  %v743_v45 = vmul.f32 0.35355338, %v739_v42 }
 0x4d2   :  { %574 = vmax.xlane.f32.xlu2 %v573_v43 }
 0x4d3   :  { %v744_v48 = vsel %vm315_vm13, %v743_v45, -inf }
 0x4d6   :  { %v570_v46 = vpop.f32.mrf.mxu2 }
 0x4d8   :  { %v741_v47 = vpop.f32.mrf.mxu0 }
 0x4da   :  { %745 = vmax.xlane.f32.xlu2 %v744_v48 }
 0x4de   :  { %v682_v50 = vpop.f32.mrf.mxu2 }
 0x4df   :  { %v686_v51 = vmul.f32 0.35355338, %v682_v50 }
 0x4e1   :  { %v687_v52 = vsel %vm315_vm13, %v686_v51, -inf }
 0x4e2   :  { %688 = vmax.xlane.f32.xlu0 %v687_v52  ;;  %499 = vadd.xlane.f32.xlu2 %v498_v53 }
 0x4e5   :  { %447 = vrot.lane.b32.xlu1 %v2396_v17, %s2836_s23 }
 0x4e6   :  { %v684_v54 = vpop.f32.mrf.mxu2 }
 0x4ed   :  { %642 = vrot.lane.b32.xlu1 %v2412_v26, %s2221_s0 }
 0x4f6   :  { %585 = vrot.lane.b32.xlu0 %v2412_v26, %s2834_s17 }
 0x535   :  { %v437_v55 = vpop.xlane.xlu2 %436 }
 0x536   :  { %v438_v58 = vsub.f32 %v434_v24, %v437_v55 }
 0x537   :  { %v632_v56 = vpop.xlane.xlu1 %631 }
 0x538   :  { %v633_v57 = vsub.f32 %v629_v30, %v632_v56  ;;  %v439_v60 = vmul.f32 1.442695, %v438_v58 }
 0x53a   :  { %v634_v59 = vmul.f32 1.442695, %v633_v57 }
 0x53c   :  { %2135 = vpow2.f32 %v634_v59 }
 0x53f   :  { %v386_v61 = vpop.xlane.xlu1 %385 }
 0x540   :  { %2137 = vrcp.f32 %v386_v61 }
 0x541   :  { %2139 = vpow2.f32 %v439_v60 }
 0x542   :  { %v2136_v62 = vpop.eup %2135 }
 0x543   :  { %v636_v17 = vsel %vm315_vm13, %v2136_v62, 0.0 }
 0x544   :  { %637 = vadd.xlane.f32.xlu2 %v636_v17 }
 0x545   :  { %v575_v63 = vpop.xlane.xlu2 %574 }
 0x546   :  { %v2138_v0 = vpop.eup %2137  ;;  %v576_v1 = vsub.f32 %v572_v40, %v575_v63 }
 0x547   :  { %v388_v2 = vmul.f32 %v2138_v0, %v2132_v35  ;;  %v2140_v3 = vpop.eup %2139 }
 0x548   :  { %v577_v4 = vmul.f32 1.442695, %v576_v1  ;;  %v441_v6 = vsel %vm315_vm13, %v2140_v3, 0.0 }
 0x549   :  { %v389_v5 = vpack.c.bf16 %v388_v2, %v388_v2 }
 0x54a   :  { %2141 = vpow2.f32 %v577_v4 }
 0x54b   :  { %1891 = vmatmul.msk.bf16.vlgmr.msrb.gmra.mxu1 %vm330_vm14, %v389_v5 }
 0x54c   :  { %442 = vadd.xlane.f32.xlu2 %v441_v6 }
 0x54d   :  { %v746_v7 = vpop.xlane.xlu2 %745 }
 0x54e   :  { %v747_v8 = vsub.f32 %v743_v45, %v746_v7 }
 0x550   :  { %v2142_v9 = vpop.eup %2141  ;;  %v748_v10 = vmul.f32 1.442695, %v747_v8 }
 0x551   :  { %v579_v11 = vsel %vm315_vm13, %v2142_v9, 0.0 }
 0x552   :  { %2143 = vpow2.f32 %v748_v10 }
 0x554   :  { %580 = vadd.xlane.f32.xlu2 %v579_v11  ;;  %v2042_v11 = vld [vmem:[%s2821_s7 + $0x8] sm:$0xff] }
 0x555   :  { %v689_v12 = vpop.xlane.xlu0 %688  ;;  %v500_v14 = vpop.xlane.xlu2 %499  ;;  %823 = vmatpush.bf16.msrb.mxu2 %v2042_v11 }
 0x556   :  { %v690_v15 = vsub.f32 %v686_v51, %v689_v12  ;;  %2145 = vrcp.f32 %v500_v14  ;;  %v2041_v12 = vld [vmem:[%s2821_s7] sm:$0xff] }
 0x557   :  { %v448_v16 = vpop.permute.xlu1 %447 }
 0x558   :  { %v2144_v18 = vpop.eup %2143  ;;  %v691_v19 = vmul.f32 1.442695, %v690_v15  ;;  %v453_v20 = vand.u32 %v448_v16, %v2421_v32 }
 0x559   :  { %v750_v21 = vsel %vm315_vm13, %v2144_v18, 0.0  ;;  %824 = vmatpush.bf16.msrb.mxu2 %v2041_v12  ;;  %v2112_v12 = vld [vmem:[%s2823_s10] ss:$0 sm:$0xff] }
 0x55a   :  { %2147 = vpow2.f32 %v691_v19  ;;  %751 = vadd.xlane.f32.xlu1 %v750_v21  ;;  %462 = vmatpush.bf16.msra.mxu3 %v453_v20 }
 0x55c   :  { %v2146_v23 = vpop.eup %2145 }
 0x55d   :  { %v502_v24 = vmul.f32 %v2146_v23, %v2134_v49 }
 0x55f   :  { %v503_v25 = vpack.c.bf16 %v502_v24, %v502_v24  ;;  %v643_v27 = vpop.permute.xlu1 %642 }
 0x560   :  { %v2148_v29 = vpop.eup %2147  ;;  %v648_v30 = vand.u32 %v643_v27, %v2421_v32 }
 0x561   :  { %1895 = vmatmul.msk.bf16.vlgmr.msra.gmra.mxu1 %vm330_vm14, %v503_v25  ;;  %v693_v31 = vsel %vm315_vm13, %v2148_v29, 0.0 }
 0x562   :  { %694 = vadd.xlane.f32.xlu0 %v693_v31  ;;  %657 = vmatpush.bf16.msrb.mxu1 %v648_v30 }
 0x568   :  { %v586_v33 = vpop.permute.xlu0 %585 }
 0x569   :  { %v591_v34 = vand.u32 %v586_v33, %v2421_v32 }
 0x56b   :  { %600 = vmatpush.bf16.msrb.mxu3 %v591_v34 }
 0x56c   :  { %699 = vrot.lane.b32.xlu2 %v2412_v26, %s2836_s23 }
 0x574   :  { %756 = vrot.lane.b32.xlu2 %v2412_v26, %s2832_s2 }
 0x5b7   :  { %v638_v35 = vpop.xlane.xlu2 %637 }
 0x5b8   :  { %2149 = vrcp.f32 %v638_v35 }
 0x5be   :  { %v2150_v37 = vpop.eup %2149 }
 0x5bf   :  { %v640_v38 = vmul.f32 %v2150_v37, %v2136_v62  ;;  %v443_v39 = vpop.xlane.xlu2 %442 }
 0x5c0   :  { %2151 = vrcp.f32 %v443_v39 }
 0x5c1   :  { %v641_v40 = vpack.c.bf16 %v640_v38, %v640_v38  ;;  %v2110_v38 = vld [vmem:[%s2820_s8] ss:$0 sm:$0xff] }
 0x5c3   :  { %1899 = vmatmul.msk.bf16.vlgmr.msrb.gmra.mxu1 %vm330_vm14, %v641_v40 }
 0x5c6   :  { %v2152_v41 = vpop.eup %2151 }
 0x5c7   :  { %v445_v42 = vmul.f32 %v2152_v41, %v2140_v3  ;;  %v581_v43 = vpop.xlane.xlu2 %580 }
 0x5c8   :  { %v407_v44 = vpop.f32.mrf.mxu1  ;;  %2153 = vrcp.f32 %v581_v43 }
 0x5c9   :  { %v446_v45 = vpack.c.bf16 %v445_v42, %v445_v42 }
 0x5cb   :  { %1893 = vmatmul.msk.bf16.vlgmr.msra.gmra.mxu3 %vm330_vm14, %v446_v45 }
 0x5cd   :  { %v752_v46 = vpop.xlane.xlu1 %751 }
 0x5ce   :  { %2155 = vrcp.f32 %v752_v46  ;;  %v2154_v49 = vpop.eup %2153 }
 0x5cf   :  { %v700_v26 = vpop.permute.xlu2 %699  ;;  %v583_v51 = vmul.f32 %v2154_v49, %v2142_v9 }
 0x5d0   :  { %v705_v47 = vand.u32 %v700_v26, %v2421_v32  ;;  %v409_v48 = vpop.f32.mrf.mxu1 }
 0x5d1   :  { %v584_v55 = vpack.c.bf16 %v583_v51, %v583_v51 }
 0x5d2   :  { %714 = vmatpush.bf16.msra.mxu3 %v705_v47 }
 0x5d4   :  { %v2156_v50 = vpop.eup %2155 }
 0x5d5   :  { %v754_v52 = vmul.f32 %v2156_v50, %v2144_v18  ;;  %v695_v56 = vpop.xlane.xlu0 %694 }
 0x5d6   :  { %2157 = vrcp.f32 %v695_v56 }
 0x5d7   :  { %v757_v53 = vpop.permute.xlu2 %756  ;;  %v755_v57 = vpack.c.bf16 %v754_v52, %v754_v52 }
 0x5d8   :  { %v762_v54 = vand.u32 %v757_v53, %v2421_v32  ;;  %v2044_v53 = vld [vmem:[%s2825_s11 + $0x8] sm:$0xff] }
 0x5da   :  { %771 = vmatpush.bf16.msra.mxu1 %v762_v54 }
 0x5db   :  { %1897 = vmatmul.msk.bf16.vlgmr.msrb.gmra.mxu3 %vm330_vm14, %v584_v55 }
 0x5dc   :  { %v2158_v59 = vpop.eup %2157  ;;  %925 = vmatpush.bf16.msrb.mxu3 %v2044_v53 }
 0x5dd   :  { %1903 = vmatmul.msk.bf16.vlgmr.msra.gmra.mxu1 %vm330_vm14, %v755_v57  ;;  %v697_v60 = vmul.f32 %v2158_v59, %v2148_v29  ;;  %v2043_v57 = vld [vmem:[%s2825_s11] sm:$0xff] }
 0x5de   :  { %v521_v58 = vpop.f32.mrf.mxu1 }
 0x5df   :  { %v698_v62 = vpack.c.bf16 %v697_v60, %v697_v60 }
 0x5e0   :  { %926 = vmatpush.bf16.msrb.mxu3 %v2043_v57 }
 0x5e6   :  { %v523_v61 = vpop.f32.mrf.mxu1 }
 0x5eb   :  { %1901 = vmatmul.msk.bf16.vlgmr.msra.gmra.mxu3 %vm330_vm14, %v698_v62 }
 0x640   :  { %v659_v17 = vpop.f32.mrf.mxu1 }
 0x641   :  { %v2075_v63 = vpack.i.bf16 %v407_v44, %v659_v17 }
 0x643   :  { %2076 = vrot.lane.b32.xlu2 %v2075_v63, %s2831_s24 }
 0x648   :  { %v661_v0 = vpop.f32.mrf.mxu1 }
 0x64e   :  { %v464_v1 = vpop.f32.mrf.mxu3 }
 0x656   :  { %v466_v2 = vpop.f32.mrf.mxu3 }
 0x65a   :  { %v773_v3 = vpop.f32.mrf.mxu1 }
 0x65b   :  { %v2085_v4 = vpack.i.bf16 %v521_v58, %v773_v3 }
 0x65d   :  { %2086 = vrot.lane.b32.xlu0 %v2085_v4, %s2830_s25 }
 0x65e   :  { %v602_v5 = vpop.f32.mrf.mxu3 }
 0x662   :  { %v775_v6 = vpop.f32.mrf.mxu1 }
 0x666   :  { %v604_v7 = vpop.f32.mrf.mxu3 }
 0x66e   :  { %v716_v8 = vpop.f32.mrf.mxu3 }
 0x66f   :  { %v2080_v9 = vpack.i.bf16 %v464_v1, %v716_v8  ;;  %v2111_v8 = vld [vmem:[%s2822_s9] ss:$0 sm:$0xff] }
 0x671   :  { %2081 = vrot.lane.b32.xlu2 %v2080_v9, %s2829_s26 }
 0x676   :  { %v718_v10 = vpop.f32.mrf.mxu3 }
 0x69d   :  { %v2077_v14 = vpop.permute.xlu2 %2076 }
 0x69e   :  { %v2078_v16 = vunpack.i.l.bf16 %v2077_v14  ;;  %v2079_v19 = vunpack.i.h.bf16 %v2077_v14 }
 0x6a0   :  { %v789_v23 = vsel %vm294_vm10, %v602_v5, %v2078_v16  ;;  %v537_v29 = vsel %vm294_vm10, %v2463_v13, %v2079_v19 }
 0x6cb   :  { %v2082_v15 = vpop.permute.xlu2 %2081 }
 0x6cc   :  { %v2083_v18 = vunpack.i.l.bf16 %v2082_v15  ;;  %v2084_v20 = vunpack.i.h.bf16 %v2082_v15 }
 0x6ce   :  { %v790_v27 = vsel %vm538_vm15, %v789_v23, %v2083_v18  ;;  %v539_v31 = vsel %vm538_vm15, %v537_v29, %v2084_v20  ;;  %v2047_v23 = vld [vmem:[%s2827_s13 + $0x10] sm:$0xff]  ;;  %v2045_v29 = vld [vmem:[%s2827_s13] sm:$0xff] }
 0x6cf   :  { %v2087_v21 = vpop.permute.xlu0 %2086 }
 0x6d0   :  { %v2089_v24 = vunpack.i.h.bf16 %v2087_v21  ;;  %v2088_v25 = vunpack.i.l.bf16 %v2087_v21  ;;  %v2048_v21 = vld [vmem:[%s2827_s13 + $0x18] sm:$0xff] }
 0x6d1   :  { %991 = vmatpush.bf16.msra.mxu0 %v2048_v21 }
 0x6d2   :  { %v791_v30 = vsel %vm540_vm3, %v790_v27, %v2088_v25  ;;  %v541_v34 = vsel %vm540_vm3, %v539_v31, %v2089_v24  ;;  %v2046_v24 = vld [vmem:[%s2827_s13 + $0x8] sm:$0xff]  ;;  %v2113_v25 = vld [vmem:[%s2824_s12] ss:$0 sm:$0xff] }
 0x6d3   :  { %v793_v33 = vrot.slane %v791_v30, 3 }
 0x6d5   :  { %v796_v35 = vsel %vm795_vm4, %v541_v34, %v793_v33  ;;  %992 = vmatpush.bf16.msra.mxu0 %v2047_v23 }
 0x6d6   :  { %v797_v37 = vpack.c.bf16 %v793_v33, %v796_v35 }
 0x6d8   :  { %1912 = vmatmul.msk.bf16.vlgmr.msrb.gmra.mxu2 %vm189_vm1, %v797_v37 }
 0x6d9   :  { %993 = vmatpush.bf16.msra.mxu0 %v2046_v24 }
 0x6dd   :  { %994 = vmatpush.bf16.msra.mxu0 %v2045_v29  ;;  %v2107_v29 = vld [vmem:[%s2816_s3 + $0x1] ss:$0 sm:$0xff]  ;;  %s2838_s3 = smov 48  }
 0x75b   :  { %v826_v39 = vpop.f32.mrf.mxu2 }
 0x75c   :  { %v831_v13 = vadd.f32 %v826_v39, %v2359_v22 }
 0x75e   :  { %v2524_v40 = vadd.f32 %v2110_v38, %v831_v13 }
 0x760   :  { %v841_v41 = vsel %vm189_vm1, %v2524_v40, 0.0 }
 0x761   :  { %842 = vadd.xlane.f32.xlu1 %v841_v41 }
 0x763   :  { %v828_v42 = vpop.f32.mrf.mxu2 }
 0x764   :  { %v832_v43 = vadd.f32 %v828_v42, %v2366_v28 }
 0x766   :  { %v2529_v44 = vadd.f32 %v2110_v38, %v832_v43 }
 0x768   :  { %v844_v45 = vsel %vm193_vm2, %v2529_v44, 0.0 }
 0x769   :  { %845 = vadd.xlane.f32.xlu2 %v844_v45 }
 0x7d4   :  { %v843_v46 = vpop.xlane.xlu1 %842 }
 0x7d5   :  { %v847_v26 = vmul.f32 %v843_v46, %v2370_v36 }
 0x7d7   :  { %v849_v22 = vsub.f32 %v2524_v40, %v847_v26 }
 0x7d9   :  { %v851_v47 = vmul.f32 %v849_v22, %v849_v22 }
 0x7db   :  { %v853_v48 = vsel %vm189_vm1, %v851_v47, 0.0 }
 0x7dc   :  { %854 = vadd.xlane.f32.xlu1 %v853_v48  ;;  %v846_v49 = vpop.xlane.xlu2 %845 }
 0x7dd   :  { %v848_v50 = vmul.f32 %v846_v49, %v2370_v36 }
 0x7df   :  { %v850_v28 = vsub.f32 %v2529_v44, %v848_v50 }
 0x7e1   :  { %v852_v51 = vmul.f32 %v850_v28, %v850_v28 }
 0x7e3   :  { %v856_v52 = vsel %vm193_vm2, %v852_v51, 0.0 }
 0x7e4   :  { %857 = vadd.xlane.f32.xlu1 %v856_v52  ;;  %v2114_v52 = vld [vmem:[%s2826_s14] ss:$0 sm:$0xff] }
 0x84f   :  { %v855_v54 = vpop.xlane.xlu1 %854 }
 0x850   :  { %v859_v55 = vmul.f32 %v855_v54, %v2370_v36 }
 0x852   :  { %v861_v56 = vadd.f32 1e-05, %v859_v55 }
 0x854   :  { %2159 = vrsqrt.f32 %v861_v56  ;;  %vm869_vm6 = vweird.f32 %v861_v56 }
 0x857   :  { %v858_v58 = vpop.xlane.xlu1 %857 }
 0x858   :  { %v860_v59 = vmul.f32 %v858_v58, %v2370_v36 }
 0x85a   :  { %v2160_v60 = vpop.eup %2159  ;;  %v862_v61 = vadd.f32 1e-05, %v860_v59 }
 0x85b   :  { %v864_v62 = vmul.f32 %v2160_v60, %v861_v56  ;;  %vm870_vm5 = vweird.f32 %v2160_v60 }
 0x85c   :  { %2161 = vrsqrt.f32 %v862_v61  ;;  %vm871_vm7 = vmor %vm869_vm6, %vm870_vm5  ;;  %vm879_vm9 = vweird.f32 %v862_v61 }
 0x85d   :  { %v865_v17 = vmul.f32 %v2160_v60, %v864_v62 }
 0x85f   :  { %v866_v63 = vmul.f32 0.5, %v865_v17 }
 0x861   :  { %v867_v0 = vsub.f32 1.5, %v866_v63 }
 0x862   :  { %v2162_v1 = vpop.eup %2161 }
 0x863   :  { %v868_v2 = vmul.f32 %v2160_v60, %v867_v0  ;;  %v874_v3 = vmul.f32 %v2162_v1, %v862_v61  ;;  %vm880_vm8 = vweird.f32 %v2162_v1 }
 0x864   :  { %vm881_vm11 = vmor %vm879_vm9, %vm880_vm8 }
 0x865   :  { %v875_v4 = vmul.f32 %v2162_v1, %v874_v3  ;;  %v872_v5 = vsel %vm871_vm7, %v2160_v60, %v868_v2 }
 0x866   :  { %v883_v9 = vmul.f32 %v872_v5, %v849_v22 }
 0x867   :  { %v876_v6 = vmul.f32 0.5, %v875_v4  ;;  %v2050_v4 = vld [vmem:[%s2819_s5 + $0x18] sm:$0xff] }
 0x868   :  { %v888_v14 = vmul.f32 %v2111_v8, %v883_v9  ;;  %1099 = vmatpush.bf16.msrb.mxu1 %v2050_v4 }
 0x869   :  { %v877_v7 = vsub.f32 1.5, %v876_v6 }
 0x86a   :  { %v893_v18 = vadd.f32 %v2112_v12, %v888_v14 }
 0x86b   :  { %v878_v10 = vmul.f32 %v2162_v1, %v877_v7 }
 0x86d   :  { %v882_v11 = vsel %vm881_vm11, %v2162_v1, %v878_v10 }
 0x86e   :  { %v884_v15 = vmul.f32 %v882_v11, %v850_v28 }
 0x870   :  { %v889_v16 = vmul.f32 %v2111_v8, %v884_v15  ;;  %v2049_v8 = vld [vmem:[%s2819_s5 + $0x10] sm:$0xff] }
 0x871   :  { %1100 = vmatpush.bf16.msrb.mxu1 %v2049_v8 }
 0x872   :  { %v894_v19 = vadd.f32 %v2112_v12, %v889_v16 }
 0x874   :  { %v895_v20 = vpack.c.bf16 %v894_v19, %v893_v18 }
 0x876   :  { %1921 = vmatmul.msk.bf16.vlgmr.msrb.gmra.mxu3 %vm189_vm1, %v895_v20 }
 0x8f9   :  { %v928_v27 = vpop.f32.mrf.mxu3 }
 0x8fa   :  { %v929_v30 = vadd.f32 %v2113_v25, %v928_v27 }
 0x8fc   :  { %v933_v31 = vmul.f32 %v929_v30, %v929_v30 }
 0x8fe   :  { %v935_v33 = vmul.f32 %v933_v31, %v929_v30 }
 0x900   :  { %v937_v34 = vmul.f32 0.044715, %v935_v33 }
 0x901   :  { %v930_v35 = vpop.f32.mrf.mxu3 }
 0x902   :  { %v939_v37 = vadd.f32 %v937_v34, %v929_v30  ;;  %v931_v38 = vadd.f32 %v2113_v25, %v930_v35  ;;  %v2108_v34 = vld [vmem:[%s2817_s4 + $0x1] ss:$0 sm:$0xff]  ;;  %s2839_s4 = smov 64  }
 0x904   :  { %v941_v39 = vmul.f32 0.7978846, %v939_v37  ;;  %v934_v13 = vmul.f32 %v931_v38, %v931_v38 }
 0x906   :  { %v936_v41 = vmul.f32 %v934_v13, %v931_v38  ;;  %2163 = vtanh.f32 %v941_v39 }
 0x908   :  { %v938_v42 = vmul.f32 0.044715, %v936_v41 }
 0x90a   :  { %v940_v43 = vadd.f32 %v938_v42, %v931_v38  ;;  %v2115_v42 = vld [vmem:[%s2818_s6 + $0x1] ss:$0 sm:$0xff]  ;;  %s2840_s6 = smov 40  }
 0x90c   :  { %v942_v45 = vmul.f32 0.7978846, %v940_v43  ;;  %v2164_v46 = vpop.eup %2163 }
 0x90d   :  { %v945_v26 = vadd.f32 1.0, %v2164_v46 }
 0x90e   :  { %2165 = vtanh.f32 %v942_v45 }
 0x90f   :  { %v947_v47 = vmul.f32 0.5, %v945_v26 }
 0x911   :  { %v949_v50 = vmul.f32 %v947_v47, %v929_v30 }
 0x914   :  { %v2166_v22 = vpop.eup %2165 }
 0x915   :  { %v946_v48 = vadd.f32 1.0, %v2166_v22 }
 0x917   :  { %v948_v49 = vmul.f32 0.5, %v946_v48 }
 0x919   :  { %v950_v28 = vmul.f32 %v948_v49, %v931_v38 }
 0x91b   :  { %v951_v51 = vpack.c.bf16 %v950_v28, %v949_v50 }
 0x91d   :  { %1938 = vmatmul.msk.bf16.vlgmr.msra.gmra.mxu0 %vm155_vm0, %v951_v51 }
 0x99a   :  { %v996_v53 = vpop.f32.mrf.mxu0 }
 0x99b   :  { %v1001_v54 = vadd.f32 %v996_v53, %v2524_v40 }
 0x99d   :  { %v2574_v55 = vadd.f32 %v2114_v52, %v1001_v54 }
 0x99f   :  { %v1013_v56 = vsel %vm189_vm1, %v2574_v55, 0.0 }
 0x9a0   :  { %1014 = vadd.xlane.f32.xlu0 %v1013_v56 }
 0x9a2   :  { %v998_v57 = vpop.f32.mrf.mxu0 }
 0x9a3   :  { %v1002_v58 = vadd.f32 %v998_v57, %v2529_v44 }
 0x9a5   :  { %v2579_v59 = vadd.f32 %v2114_v52, %v1002_v58 }
 0x9a7   :  { %v1016_v60 = vsel %vm193_vm2, %v2579_v59, 0.0 }
 0x9a8   :  { %1017 = vadd.xlane.f32.xlu1 %v1016_v60 }
 0xa13   :  { %v1015_v61 = vpop.xlane.xlu0 %1014 }
 0xa14   :  { %v1019_v62 = vmul.f32 %v1015_v61, %v2370_v36 }
 0xa16   :  { %v1021_v40 = vsub.f32 %v2574_v55, %v1019_v62 }
 0xa18   :  { %v1023_v17 = vmul.f32 %v1021_v40, %v1021_v40 }
 0xa1a   :  { %v1025_v63 = vsel %vm189_vm1, %v1023_v17, 0.0 }
 0xa1b   :  { %1026 = vadd.xlane.f32.xlu1 %v1025_v63  ;;  %v1018_v0 = vpop.xlane.xlu1 %1017 }
 0xa1c   :  { %v1020_v1 = vmul.f32 %v1018_v0, %v2370_v36 }
 0xa1e   :  { %v1022_v44 = vsub.f32 %v2579_v59, %v1020_v1 }
 0xa20   :  { %v1024_v2 = vmul.f32 %v1022_v44, %v1022_v44 }
 0xa22   :  { %v1028_v3 = vsel %vm193_vm2, %v1024_v2, 0.0 }
 0xa23   :  { %1029 = vadd.xlane.f32.xlu1 %v1028_v3 }
 0xa8e   :  { %v1027_v5 = vpop.xlane.xlu1 %1026 }
 0xa8f   :  { %v1031_v6 = vmul.f32 %v1027_v5, %v2370_v36 }
 0xa91   :  { %v1033_v7 = vadd.f32 1e-05, %v1031_v6 }
 0xa93   :  { %2167 = vrsqrt.f32 %v1033_v7  ;;  %vm1041_vm5 = vweird.f32 %v1033_v7 }
 0xa96   :  { %v1030_v9 = vpop.xlane.xlu1 %1029 }
 0xa97   :  { %v1032_v10 = vmul.f32 %v1030_v9, %v2370_v36 }
 0xa99   :  { %v2168_v11 = vpop.eup %2167  ;;  %v1034_v12 = vadd.f32 1e-05, %v1032_v10 }
 0xa9a   :  { %v1036_v14 = vmul.f32 %v2168_v11, %v1033_v7  ;;  %vm1042_vm12 = vweird.f32 %v2168_v11 }
 0xa9b   :  { %2169 = vrsqrt.f32 %v1034_v12  ;;  %vm1043_vm6 = vmor %vm1041_vm5, %vm1042_vm12  ;;  %vm1051_vm8 = vweird.f32 %v1034_v12 }
 0xa9c   :  { %v1037_v15 = vmul.f32 %v2168_v11, %v1036_v14 }
 0xa9e   :  { %v1038_v16 = vmul.f32 0.5, %v1037_v15 }
 0xaa0   :  { %v1039_v18 = vsub.f32 1.5, %v1038_v16 }
 0xaa1   :  { %v2170_v19 = vpop.eup %2169 }
 0xaa2   :  { %v1040_v20 = vmul.f32 %v2168_v11, %v1039_v18  ;;  %v1046_v21 = vmul.f32 %v2170_v19, %v1034_v12  ;;  %vm1052_vm7 = vweird.f32 %v2170_v19 }
 0xaa3   :  { %vm1053_vm9 = vmor %vm1051_vm8, %vm1052_vm7 }
 0xaa4   :  { %v1047_v23 = vmul.f32 %v2170_v19, %v1046_v21  ;;  %v1044_v24 = vsel %vm1043_vm6, %v2168_v11, %v1040_v20 }
 0xaa5   :  { %v1055_v30 = vmul.f32 %v1044_v24, %v1021_v40 }
 0xaa6   :  { %v1048_v25 = vmul.f32 0.5, %v1047_v23 }
 0xaa7   :  { %v1060_v35 = vmul.f32 %v2107_v29, %v1055_v30 }
 0xaa8   :  { %v1049_v27 = vsub.f32 1.5, %v1048_v25 }
 0xaa9   :  { %v1065_v39 = vadd.f32 %v2108_v34, %v1060_v35 }
 0xaaa   :  { %v1050_v31 = vmul.f32 %v2170_v19, %v1049_v27 }
 0xaac   :  { %v1054_v33 = vsel %vm1053_vm9, %v2170_v19, %v1050_v31 }
 0xaad   :  { %v1056_v37 = vmul.f32 %v1054_v33, %v1022_v44 }
 0xaaf   :  { %v1061_v38 = vmul.f32 %v2107_v29, %v1056_v37 }
 0xab1   :  { %v1066_v13 = vadd.f32 %v2108_v34, %v1061_v38 }
 0xab3   :  { %v1067_v41 = vpack.c.bf16 %v1066_v13, %v1065_v39 }
 0xab5   :  { %1954 = vmatmul.msk.bf16.vlgmr.msrb.gmra.mxu1 %vm189_vm1, %v1067_v41 }
 0xb32   :  { %v1102_v43 = vpop.f32.mrf.mxu1 }
 0xb33   :  { %v1103_v45 = vadd.f32 %v2115_v42, %v1102_v43 }
 0xb35   :  { %v2607_v46 = vpack.c.bf16 %v1103_v45, %v1103_v45 }
 0xb37   :  { %1223 = vrot.lane.b32.xlu0 %v2607_v46, %s2215_s19  ;;  %1166 = vrot.lane.b32.xlu1 %v2607_v46, %s2212_s16 }
 0xb38   :  { %1109 = vrot.lane.b32.xlu2 %v2607_v46, %s2214_s18 }
 0xb3a   :  { %v1104_v26 = vpop.f32.mrf.mxu1 }
 0xb3b   :  { %v1105_v22 = vadd.f32 %v2115_v42, %v1104_v26 }
 0xb3d   :  { %v1350_v47 = vpack.c.bf16 %v1105_v22, %v1103_v45 }
 0xb3f   :  { %v1352_v48 = vshrl.u32 %v1350_v47, 16  ;;  %v1355_v49 = vshll.u32 %v1350_v47, 16  ;;  %1221 = vrot.lane.b32.xlu1 %v2607_v46, %s2217_s21 }
 0xb40   :  { %1164 = vrot.lane.b32.xlu2 %v2607_v46, %s2216_s20 }
 0xb41   :  { %v1354_v50 = vrot.slane %v1352_v48, 2  ;;  %v1357_v28 = vrot.slane %v1355_v49, 3 }
 0xb43   :  { %v2619_v51 = vor.u32 %v1357_v28, %v1354_v50 }
 0xb45   :  { %1359 = vrot.lane.b32.xlu0 %v2619_v51, %s2214_s18  ;;  %s2842_s18 = smov 24  }
 0xb47   :  { %1278 = vrot.lane.b32.xlu1 %v2607_v46, %s2218_s1 }
 0xb48   :  { %1280 = vrot.lane.b32.xlu2 %v2607_v46, %s2220_s22 }
 0xb4d   :  { %1473 = vrot.lane.b32.xlu0 %v2619_v51, %s2215_s19  ;;  %s2843_s19 = smov 16  }
 0xb4f   :  { %1414 = vrot.lane.b32.xlu1 %v2619_v51, %s2216_s20 }
 0xb50   :  { %1416 = vrot.lane.b32.xlu2 %v2619_v51, %s2212_s16  ;;  %s2841_s16 = smov 8  }
 0xb55   :  { %1530 = vrot.lane.b32.xlu0 %v2619_v51, %s2220_s22 }
 0xb57   :  { %1528 = vrot.lane.b32.xlu1 %v2619_v51, %s2218_s1 }
 0xb58   :  { %1471 = vrot.lane.b32.xlu2 %v2619_v51, %s2217_s21 }
 0xb5f   :  { %1200 = vrot.lane.b32.xlu1 %v2607_v46, %s2221_s0 }
 0xb92   :  { %v1110_v52 = vpop.permute.xlu2 %1109 }
 0xb93   :  { %v1115_v53 = vsel %vm294_vm10, %v1110_v52, 0 }
 0xb94   :  { %1124 = vmatpush.bf16.xpose.msra.mxu2 %v1115_v53 }
 0xb9a   :  { %v1165_v54 = vpop.permute.xlu2 %1164 }
 0xb9b   :  { %1955 = vmatmul.msk.bf16.vlgmr.msra.gmra.mxu2 %vm294_vm10, %v2607_v46 }
 0xba2   :  { %v1281_v56 = vpop.permute.xlu2 %1280 }
 0xba3   :  { %v1286_v62 = vsel %vm294_vm10, %v1281_v56, 0 }
 0xba9   :  { %v1224_v57 = vpop.permute.xlu0 %1223  ;;  %v1167_v58 = vpop.permute.xlu1 %1166 }
 0xbaa   :  { %v1229_v60 = vsel %vm294_vm10, %v1224_v57, 0  ;;  %v1172_v61 = vsel %vm294_vm10, %v1167_v58, 0  ;;  %v1417_v40 = vpop.permute.xlu2 %1416 }
 0xbab   :  { %1181 = vmatpush.bf16.xpose.msrb.mxu0 %v1172_v61  ;;  %1238 = vmatpush.bf16.xpose.msrb.mxu2 %v1229_v60  ;;  %v1422_v63 = vsel %vm294_vm10, %v1417_v40, 0 }
 0xbb1   :  { %v1222_v17 = vpop.permute.xlu1 %1221 }
 0xbb2   :  { %1957 = vmatmul.msk.bf16.vlgmr.msrb.gmra.mxu0 %vm294_vm10, %v1165_v54  ;;  %1959 = vmatmul.msk.bf16.vlgmr.msrb.gmra.mxu2 %vm294_vm10, %v1222_v17  ;;  %v1472_v8 = vpop.permute.xlu2 %1471 }
 0xbb3   :  { %1295 = vmatpush.bf16.xpose.msra.mxu0 %v1286_v62 }
 0xbb7   :  { %v1360_v0 = vpop.permute.xlu0 %1359 }
 0xbb8   :  { %v1365_v1 = vsel %vm294_vm10, %v1360_v0, 0 }
 0xbb9   :  { %v1279_v44 = vpop.permute.xlu1 %1278  ;;  %1374 = vmatpush.bf16.xpose.msra.mxu2 %v1365_v1 }
 0xbbb   :  { %1431 = vmatpush.bf16.xpose.msrb.mxu0 %v1422_v63 }
 0xbbf   :  { %v1474_v2 = vpop.permute.xlu0 %1473 }
 0xbc0   :  { %v1479_v3 = vsel %vm294_vm10, %v1474_v2, 0 }
 0xbc1   :  { %v1415_v4 = vpop.permute.xlu1 %1414  ;;  %1488 = vmatpush.bf16.xpose.msrb.mxu2 %v1479_v3 }
 0xbc2   :  { %1961 = vmatmul.msk.bf16.vlgmr.msra.gmra.mxu0 %vm294_vm10, %v1279_v44  ;;  %1963 = vmatmul.msk.bf16.vlgmr.msra.gmra.mxu2 %vm294_vm10, %v2619_v51 }
 0xbc7   :  { %v1531_v5 = vpop.permute.xlu0 %1530 }
 0xbc8   :  { %v1536_v6 = vsel %vm294_vm10, %v1531_v5, 0 }
 0xbc9   :  { %v1529_v7 = vpop.permute.xlu1 %1528  ;;  %1545 = vmatpush.bf16.xpose.msra.mxu0 %v1536_v6 }
 0xbd1   :  { %v1201_v9 = vpop.permute.xlu1 %1200 }
 0xbd2   :  { %v1206_v10 = vand.u32 %v1201_v9, %v2421_v32  ;;  %1965 = vmatmul.msk.bf16.vlgmr.msrb.gmra.mxu0 %vm294_vm10, %v1415_v4  ;;  %1967 = vmatmul.msk.bf16.vlgmr.msrb.gmra.mxu2 %vm294_vm10, %v1472_v8 }
 0xbd4   :  { %1215 = vmatpush.bf16.msra.mxu1 %v1206_v10 }
 0xbe2   :  { %1969 = vmatmul.msk.bf16.vlgmr.msra.gmra.mxu0 %vm294_vm10, %v1529_v7 }
 0xc1e   :  { %v1126_v11 = vpop.f32.mrf.mxu2 }
 0xc1f   :  { %v1130_v12 = vmul.f32 0.35355338, %v1126_v11 }
 0xc21   :  { %v1131_v14 = vsel %vm315_vm13, %v1130_v12, -inf }
 0xc22   :  { %1132 = vmax.xlane.f32.xlu2 %v1131_v14 }
 0xc26   :  { %v1128_v15 = vpop.f32.mrf.mxu2 }
 0xc2f   :  { %v1183_v16 = vpop.f32.mrf.mxu0 }
 0xc30   :  { %v1187_v18 = vmul.f32 0.35355338, %v1183_v16 }
 0xc32   :  { %v1188_v19 = vsel %vm315_vm13, %v1187_v18, -inf }
 0xc33   :  { %1189 = vmax.xlane.f32.xlu0 %v1188_v19 }
 0xc35   :  { %v1240_v20 = vpop.f32.mrf.mxu2 }
 0xc36   :  { %v2662_v21 = vmul.f32 0.35355338, %v1240_v20 }
 0xc37   :  { %v1185_v23 = vpop.f32.mrf.mxu0 }
 0xc38   :  { %v1245_v24 = vsel %vm315_vm13, %v2662_v21, -inf }
 0xc39   :  { %1246 = vmax.xlane.f32.xlu1 %v1245_v24 }
 0xc3d   :  { %v1242_v25 = vpop.f32.mrf.mxu2 }
 0xc3f   :  { %v1297_v27 = vpop.f32.mrf.mxu0 }
 0xc40   :  { %v1301_v29 = vmul.f32 0.35355338, %v1297_v27 }
 0xc42   :  { %v1302_v30 = vsel %vm315_vm13, %v1301_v29, -inf }
 0xc43   :  { %1303 = vmax.xlane.f32.xlu2 %v1302_v30 }
 0xc45   :  { %v1376_v31 = vpop.f32.mrf.mxu2 }
 0xc46   :  { %v1380_v45 = vmul.f32 0.35355338, %v1376_v31 }
 0xc47   :  { %1257 = vrot.lane.b32.xlu0 %v2607_v46, %s2838_s3  ;;  %v1299_v33 = vpop.f32.mrf.mxu0 }
 0xc48   :  { %v1381_v26 = vsel %vm315_vm13, %v1380_v45, -inf }
 0xc4d   :  { %v1378_v34 = vpop.f32.mrf.mxu2 }
 0xc4f   :  { %v1433_v35 = vpop.f32.mrf.mxu0 }
 0xc50   :  { %v2669_v37 = vmul.f32 0.35355338, %v1433_v35 }
 0xc52   :  { %v1438_v38 = vsel %vm315_vm13, %v2669_v37, -inf }
 0xc53   :  { %1439 = vmax.xlane.f32.xlu1 %v1438_v38 }
 0xc55   :  { %v1490_v39 = vpop.f32.mrf.mxu2 }
 0xc56   :  { %v1494_v22 = vmul.f32 0.35355338, %v1490_v39 }
 0xc57   :  { %v1435_v13 = vpop.f32.mrf.mxu0 }
 0xc58   :  { %v1495_v47 = vsel %vm315_vm13, %v1494_v22, -inf }
 0xc5b   :  { %1143 = vrot.lane.b32.xlu2 %v2607_v46, %s2839_s4 }
 0xc5d   :  { %v1492_v41 = vpop.f32.mrf.mxu2 }
 0xc5f   :  { %v1547_v42 = vpop.f32.mrf.mxu0 }
 0xc60   :  { %v2679_v48 = vmul.f32 0.35355338, %v1547_v42 }
 0xc62   :  { %v1552_v49 = vsel %vm315_vm13, %v2679_v48, -inf }
 0xc67   :  { %v1549_v43 = vpop.f32.mrf.mxu0 }
 0xc6c   :  { %1314 = vrot.lane.b32.xlu1 %v2607_v46, %s2840_s6 }
 0xc71   :  { %1382 = vmax.xlane.f32.xlu0 %v1381_v26 }
 0xc84   :  { %1496 = vmax.xlane.f32.xlu2 %v1495_v47 }
 0xc95   :  { %v1133_v50 = vpop.xlane.xlu2 %1132 }
 0xc96   :  { %1553 = vmax.xlane.f32.xlu1 %v1552_v49  ;;  %v1134_v53 = vsub.f32 %v1130_v12, %v1133_v50 }
 0xc98   :  { %v1135_v46 = vmul.f32 1.442695, %v1134_v53 }
 0xca6   :  { %v1190_v28 = vpop.xlane.xlu0 %1189 }
 0xca7   :  { %v1191_v52 = vsub.f32 %v1187_v18, %v1190_v28 }
 0xca9   :  { %v1192_v54 = vmul.f32 1.442695, %v1191_v52 }
 0xcab   :  { %2171 = vpow2.f32 %v1192_v54 }
 0xcac   :  { %2173 = vpow2.f32 %v1135_v46  ;;  %v1247_v3 = vpop.xlane.xlu1 %1246 }
 0xcad   :  { %v1248_v9 = vsub.f32 %v2662_v21, %v1247_v3 }
 0xcaf   :  { %v1249_v11 = vmul.f32 1.442695, %v1248_v9 }
 0xcb1   :  { %v2683_v56 = vpop.eup %2171 }
 0xcb2   :  { %v1194_v57 = vsel %vm315_vm13, %v2683_v56, 0.0  ;;  %v2687_v60 = vpop.eup %2173 }
 0xcb3   :  { %1195 = vadd.xlane.f32.xlu0 %v1194_v57  ;;  %v1137_v40 = vsel %vm315_vm13, %v2687_v60, 0.0 }
 0xcb6   :  { %v1304_v58 = vpop.xlane.xlu2 %1303 }
 0xcb7   :  { %v1305_v61 = vsub.f32 %v1301_v29, %v1304_v58 }
 0xcb9   :  { %v1306_v62 = vmul.f32 1.442695, %v1305_v61  ;;  %v1258_v17 = vpop.permute.xlu0 %1257 }
 0xcba   :  { %v1263_v1 = vand.u32 %v1258_v17, %v2421_v32 }
 0xcbb   :  { %2175 = vpow2.f32 %v1306_v62  ;;  %1138 = vadd.xlane.f32.xlu0 %v1137_v40 }
 0xcbe   :  { %v1144_v63 = vpop.permute.xlu2 %1143 }
 0xcbf   :  { %v1149_v0 = vand.u32 %v1144_v63, %v2421_v32 }
 0xcc1   :  { %v2176_v44 = vpop.eup %2175  ;;  %1158 = vmatpush.bf16.msra.mxu3 %v1149_v0 }
 0xcc2   :  { %v1308_v2 = vsel %vm315_vm13, %v2176_v44, 0.0 }
 0xcc3   :  { %1309 = vadd.xlane.f32.xlu2 %v1308_v2 }
 0xcc5   :  { %1272 = vmatpush.bf16.msrb.mxu3 %v1263_v1 }
 0xcc6   :  { %v1440_v4 = vpop.xlane.xlu1 %1439 }
 0xcc7   :  { %v1441_v14 = vsub.f32 %v2669_v37, %v1440_v4 }
 0xcc9   :  { %v1442_v16 = vmul.f32 1.442695, %v1441_v14 }
 0xccf   :  { %1393 = vrot.lane.b32.xlu0 %v2619_v51, %s2839_s4 }
 0xcdb   :  { %1450 = vrot.lane.b32.xlu2 %v2619_v51, %s2221_s0 }
 0xcde   :  { %v1315_v5 = vpop.permute.xlu1 %1314 }
 0xcdf   :  { %v1320_v6 = vand.u32 %v1315_v5, %v2421_v32 }
 0xce1   :  { %1329 = vmatpush.bf16.msrb.mxu1 %v1320_v6 }
 0xce4   :  { %v1383_v7 = vpop.xlane.xlu0 %1382 }
 0xce5   :  { %v1384_v8 = vsub.f32 %v1380_v45, %v1383_v7 }
 0xce7   :  { %v1385_v10 = vmul.f32 1.442695, %v1384_v8 }
 0xce9   :  { %2177 = vpow2.f32 %v1385_v10 }
 0xcea   :  { %2179 = vpow2.f32 %v1249_v11 }
 0xceb   :  { %2181 = vpow2.f32 %v1442_v16 }
 0xcef   :  { %v2700_v12 = vpop.eup %2177 }
 0xcf0   :  { %v1387_v15 = vsel %vm315_vm13, %v2700_v12, 0.0  ;;  %v2180_v18 = vpop.eup %2179 }
 0xcf1   :  { %1388 = vadd.xlane.f32.xlu1 %v1387_v15  ;;  %v1251_v23 = vsel %vm315_vm13, %v2180_v18, 0.0  ;;  %v2182_v24 = vpop.eup %2181 }
 0xcf2   :  { %v1444_v25 = vsel %vm315_vm13, %v2182_v24, 0.0 }
 0xcf7   :  { %v1497_v19 = vpop.xlane.xlu2 %1496 }
 0xcf8   :  { %v1498_v20 = vsub.f32 %v1494_v22, %v1497_v19 }
 0xcf9   :  { %1252 = vadd.xlane.f32.xlu0 %v1251_v23 }
 0xcfa   :  { %v1499_v21 = vmul.f32 1.442695, %v1498_v20 }
 0xcfc   :  { %2183 = vpow2.f32 %v1499_v21 }
 0xd01   :  { %1445 = vadd.xlane.f32.xlu0 %v1444_v25 }
 0xd02   :  { %v2707_v27 = vpop.eup %2183 }
 0xd03   :  { %v1501_v29 = vsel %vm315_vm13, %v2707_v27, 0.0 }
 0xd04   :  { %1502 = vadd.xlane.f32.xlu1 %v1501_v29 }
 0xd09   :  { %v1554_v30 = vpop.xlane.xlu1 %1553 }
 0xd0a   :  { %v1555_v31 = vsub.f32 %v2679_v48, %v1554_v30 }
 0xd0c   :  { %v1556_v33 = vmul.f32 1.442695, %v1555_v31 }
 0xd0e   :  { %2185 = vpow2.f32 %v1556_v33 }
 0xd14   :  { %v2186_v34 = vpop.eup %2185 }
 0xd15   :  { %1564 = vrot.lane.b32.xlu0 %v2619_v51, %s2840_s6  ;;  %v1558_v35 = vsel %vm315_vm13, %v2186_v34, 0.0 }
 0xd16   :  { %1559 = vadd.xlane.f32.xlu2 %v1558_v35  ;;  %v2051_v35 = vld [vmem:[%s2821_s7 + $0x10] sm:$0xff] }
 0xd1d   :  { %1507 = vrot.lane.b32.xlu1 %v2619_v51, %s2838_s3 }
 0xd26   :  { %v1196_v37 = vpop.xlane.xlu0 %1195 }
 0xd27   :  { %2187 = vrcp.f32 %v1196_v37 }
 0xd2d   :  { %v2188_v38 = vpop.eup %2187 }
 0xd2e   :  { %v1198_v39 = vmul.f32 %v2188_v38, %v2683_v56  ;;  %v1139_v13 = vpop.xlane.xlu0 %1138 }
 0xd2f   :  { %2189 = vrcp.f32 %v1139_v13 }
 0xd30   :  { %v1199_v41 = vpack.c.bf16 %v1198_v39, %v1198_v39 }
 0xd32   :  { %1958 = vmatmul.msk.bf16.vlgmr.msra.gmra.mxu1 %vm330_vm14, %v1199_v41 }
 0xd35   :  { %v2190_v42 = vpop.eup %2189 }
 0xd36   :  { %v1141_v43 = vmul.f32 %v2190_v42, %v2687_v60  ;;  %v1310_v45 = vpop.xlane.xlu2 %1309 }
 0xd37   :  { %2191 = vrcp.f32 %v1310_v45 }
 0xd38   :  { %v1142_v26 = vpack.c.bf16 %v1141_v43, %v1141_v43 }
 0xd3a   :  { %1956 = vmatmul.msk.bf16.vlgmr.msra.gmra.mxu3 %vm330_vm14, %v1142_v26 }
 0xd3d   :  { %v2192_v22 = vpop.eup %2191 }
 0xd3e   :  { %v1312_v51 = vmul.f32 %v2192_v22, %v2176_v44  ;;  %v1451_v47 = vpop.permute.xlu2 %1450 }
 0xd3f   :  { %v1456_v48 = vand.u32 %v1451_v47, %v2421_v32 }
 0xd40   :  { %v1313_v49 = vpack.c.bf16 %v1312_v51, %v1312_v51 }
 0xd41   :  { %v1394_v50 = vpop.permute.xlu0 %1393  ;;  %1465 = vmatpush.bf16.msra.mxu1 %v1456_v48 }
 0xd42   :  { %v1399_v28 = vand.u32 %v1394_v50, %v2421_v32  ;;  %1962 = vmatmul.msk.bf16.vlgmr.msrb.gmra.mxu1 %vm330_vm14, %v1313_v49 }
 0xd44   :  { %1408 = vmatpush.bf16.msra.mxu3 %v1399_v28 }
 0xd64   :  { %v1389_v56 = vpop.xlane.xlu1 %1388 }
 0xd6c   :  { %v1253_v52 = vpop.xlane.xlu0 %1252 }
 0xd6d   :  { %2193 = vrcp.f32 %v1253_v52 }
 0xd73   :  { %v2194_v53 = vpop.eup %2193 }
 0xd74   :  { %v1255_v54 = vmul.f32 %v2194_v53, %v2180_v18  ;;  %v1446_v46 = vpop.xlane.xlu0 %1445 }
 0xd75   :  { %2195 = vrcp.f32 %v1446_v46 }
 0xd76   :  { %v1256_v57 = vpack.c.bf16 %v1255_v54, %v1255_v54  ;;  %2197 = vrcp.f32 %v1389_v56  ;;  %v2116_v54 = vld [vmem:[%s2820_s8 + $0x1] ss:$0 sm:$0xff] }
 0xd77   :  { %v1503_v63 = vpop.xlane.xlu1 %1502 }
 0xd78   :  { %1960 = vmatmul.msk.bf16.vlgmr.msrb.gmra.mxu3 %vm330_vm14, %v1256_v57  ;;  %2199 = vrcp.f32 %v1503_v63 }
 0xd7b   :  { %v2196_v58 = vpop.eup %2195 }
 0xd7c   :  { %v1448_v60 = vmul.f32 %v2196_v58, %v2182_v24  ;;  %v2198_v62 = vpop.eup %2197 }
 0xd7d   :  { %v1391_v40 = vmul.f32 %v2198_v62, %v2700_v12 }
 0xd7e   :  { %v1449_v61 = vpack.c.bf16 %v1448_v60, %v1448_v60  ;;  %v2200_v2 = vpop.eup %2199 }
 0xd7f   :  { %v1392_v17 = vpack.c.bf16 %v1391_v40, %v1391_v40  ;;  %v1505_v7 = vmul.f32 %v2200_v2, %v2707_v27 }
 0xd80   :  { %1966 = vmatmul.msk.bf16.vlgmr.msra.gmra.mxu1 %vm330_vm14, %v1449_v61 }
 0xd81   :  { %v1506_v9 = vpack.c.bf16 %v1505_v7, %v1505_v7 }
 0xd87   :  { %v1565_v0 = vpop.permute.xlu0 %1564 }
 0xd88   :  { %v1570_v1 = vand.u32 %v1565_v0, %v2421_v32  ;;  %1964 = vmatmul.msk.bf16.vlgmr.msra.gmra.mxu3 %vm330_vm14, %v1392_v17 }
 0xd89   :  { %v1560_v44 = vpop.xlane.xlu2 %1559 }
 0xd8a   :  { %2201 = vrcp.f32 %v1560_v44  ;;  %1579 = vmatpush.bf16.msrb.mxu1 %v1570_v1 }
 0xd8f   :  { %v1508_v3 = vpop.permute.xlu1 %1507 }
 0xd90   :  { %v2202_v4 = vpop.eup %2201  ;;  %v1513_v5 = vand.u32 %v1508_v3, %v2421_v32 }
 0xd91   :  { %v1562_v6 = vmul.f32 %v2202_v4, %v2186_v34  ;;  %v2052_v34 = vld [vmem:[%s2821_s7 + $0x18] sm:$0xff] }
 0xd92   :  { %1522 = vmatpush.bf16.msrb.mxu3 %v1513_v5  ;;  %1631 = vmatpush.bf16.msra.mxu2 %v2052_v34  ;;  %v2054_v5 = vld [vmem:[%s2825_s11 + $0x18] sm:$0xff] }
 0xd93   :  { %v1563_v8 = vpack.c.bf16 %v1562_v6, %v1562_v6 }
 0xd95   :  { %1970 = vmatmul.msk.bf16.vlgmr.msrb.gmra.mxu1 %vm330_vm14, %v1563_v8 }
 0xd96   :  { %1632 = vmatpush.bf16.msra.mxu2 %v2051_v35  ;;  %1738 = vmatpush.bf16.msra.mxu3 %v2054_v5 }
 0xd98   :  { %1968 = vmatmul.msk.bf16.vlgmr.msrb.gmra.mxu3 %vm330_vm14, %v1506_v9  ;;  %v2053_v9 = vld [vmem:[%s2825_s11 + $0x10] sm:$0xff] }
 0xd9a   :  { %1739 = vmatpush.bf16.msra.mxu3 %v2053_v9 }
 0xdaf   :  { %v1217_v10 = vpop.f32.mrf.mxu1 }
 0xdb7   :  { %v1219_v11 = vpop.f32.mrf.mxu1 }
 0xdbd   :  { %v1160_v12 = vpop.f32.mrf.mxu3 }
 0xdbf   :  { %v1331_v14 = vpop.f32.mrf.mxu1 }
 0xdc5   :  { %v1162_v15 = vpop.f32.mrf.mxu3 }
 0xdc7   :  { %v1333_v16 = vpop.f32.mrf.mxu1 }
 0xdfb   :  { %v1274_v18 = vpop.f32.mrf.mxu3 }
 0xdfd   :  { %v1467_v19 = vpop.f32.mrf.mxu1 }
 0xdfe   :  { %v2090_v20 = vpack.i.bf16 %v1217_v10, %v1467_v19 }
 0xe00   :  { %2091 = vrot.lane.b32.xlu0 %v2090_v20, %s2841_s16 }
 0xe03   :  { %v1276_v32 = vpop.f32.mrf.mxu3 }
 0xe05   :  { %v1469_v23 = vpop.f32.mrf.mxu1 }
 0xe0b   :  { %v1410_v21 = vpop.f32.mrf.mxu3 }
 0xe12   :  { %v1581_v24 = vpop.f32.mrf.mxu1 }
 0xe13   :  { %v2100_v25 = vpack.i.bf16 %v1331_v14, %v1581_v24  ;;  %v1412_v27 = vpop.f32.mrf.mxu3 }
 0xe15   :  { %2101 = vrot.lane.b32.xlu0 %v2100_v25, %s2842_s18 }
 0xe1a   :  { %v1583_v29 = vpop.f32.mrf.mxu1 }
 0xe1b   :  { %v1524_v30 = vpop.f32.mrf.mxu3 }
 0xe1c   :  { %v2095_v31 = vpack.i.bf16 %v1274_v18, %v1524_v30 }
 0xe1e   :  { %2096 = vrot.lane.b32.xlu1 %v2095_v31, %s2843_s19 }
 0xe23   :  { %v1526_v33 = vpop.f32.mrf.mxu3 }
 0xe24   :  { %v2118_v33 = vld [vmem:[%s2823_s10 + $0x1] ss:$0 sm:$0xff] }
 0xe72   :  { %v2092_v37 = vpop.permute.xlu0 %2091 }
 0xe73   :  { %v2094_v38 = vunpack.i.h.bf16 %v2092_v37  ;;  %v2093_v39 = vunpack.i.l.bf16 %v2092_v37 }
 0xe75   :  { %v1347_v45 = vsel %vm294_vm10, %v1160_v12, %v2094_v38  ;;  %v1597_v26 = vsel %vm294_vm10, %v1410_v21, %v2093_v39 }
 0xe87   :  { %v2102_v13 = vpop.permute.xlu0 %2101 }
 0xe88   :  { %v2103_v22 = vunpack.i.l.bf16 %v2102_v13  ;;  %v2104_v48 = vunpack.i.h.bf16 %v2102_v13 }
 0xe90   :  { %v2097_v41 = vpop.permute.xlu1 %2096 }
 0xe91   :  { %v2099_v42 = vunpack.i.h.bf16 %v2097_v41  ;;  %v2098_v43 = vunpack.i.l.bf16 %v2097_v41  ;;  %v2058_v41 = vld [vmem:[%s2827_s13 + $0x38] sm:$0xff] }
 0xe92   :  { %1805 = vmatpush.bf16.msrb.mxu0 %v2058_v41 }
 0xe93   :  { %v1348_v51 = vsel %vm538_vm15, %v1347_v45, %v2099_v42  ;;  %v1598_v47 = vsel %vm538_vm15, %v1597_v26, %v2098_v43  ;;  %v2057_v42 = vld [vmem:[%s2827_s13 + $0x30] sm:$0xff]  ;;  %v2056_v43 = vld [vmem:[%s2827_s13 + $0x28] sm:$0xff]  ;;  %v2119_v45 = vld [vmem:[%s2824_s12 + $0x1] ss:$0 sm:$0xff] }
 0xe94   :  { %v1599_v49 = vsel %vm540_vm3, %v1598_v47, %v2103_v22  ;;  %v1349_v28 = vsel %vm540_vm3, %v1348_v51, %v2104_v48  ;;  %v2055_v22 = vld [vmem:[%s2827_s13 + $0x20] sm:$0xff] }
 0xe95   :  { %v1601_v50 = vrot.slane %v1599_v49, 3 }
 0xe96   :  { %1806 = vmatpush.bf16.msrb.mxu0 %v2057_v42 }
 0xe97   :  { %v1603_v52 = vsel %vm795_vm4, %v1349_v28, %v1601_v50 }
 0xe98   :  { %v1604_v53 = vpack.c.bf16 %v1601_v50, %v1603_v52 }
 0xe9a   :  { %1983 = vmatmul.msk.bf16.vlgmr.msra.gmra.mxu2 %vm189_vm1, %v1604_v53  ;;  %1807 = vmatpush.bf16.msrb.mxu0 %v2056_v43 }
 0xe9e   :  { %1808 = vmatpush.bf16.msrb.mxu0 %v2055_v22 }
 0xf1d   :  { %v1634_v46 = vpop.f32.mrf.mxu2 }
 0xf1e   :  { %v1639_v56 = vadd.f32 %v1634_v46, %v2574_v55 }
 0xf20   :  { %v2754_v57 = vadd.f32 %v2116_v54, %v1639_v56 }
 0xf22   :  { %v1652_v58 = vsel %vm189_vm1, %v2754_v57, 0.0 }
 0xf23   :  { %1653 = vadd.xlane.f32.xlu1 %v1652_v58 }
 0xf25   :  { %v1636_v60 = vpop.f32.mrf.mxu2 }
 0xf26   :  { %v1640_v61 = vadd.f32 %v1636_v60, %v2579_v59 }
 0xf28   :  { %v2759_v62 = vadd.f32 %v2116_v54, %v1640_v61 }
 0xf2a   :  { %v1655_v40 = vsel %vm193_vm2, %v2759_v62, 0.0 }
 0xf2b   :  { %1656 = vadd.xlane.f32.xlu0 %v1655_v40 }
 0xf96   :  { %v1654_v17 = vpop.xlane.xlu1 %1653 }
 0xf97   :  { %v1658_v63 = vmul.f32 %v1654_v17, %v2370_v36 }
 0xf99   :  { %v1660_v55 = vsub.f32 %v2754_v57, %v1658_v63 }
 0xf9b   :  { %v1662_v0 = vmul.f32 %v1660_v55, %v1660_v55 }
 0xf9d   :  { %v1664_v1 = vsel %vm189_vm1, %v1662_v0, 0.0 }
 0xf9e   :  { %1665 = vadd.xlane.f32.xlu2 %v1664_v1  ;;  %v1657_v44 = vpop.xlane.xlu0 %1656 }
 0xf9f   :  { %v1659_v2 = vmul.f32 %v1657_v44, %v2370_v36 }
 0xfa1   :  { %v1661_v59 = vsub.f32 %v2759_v62, %v1659_v2 }
 0xfa3   :  { %v1663_v3 = vmul.f32 %v1661_v59, %v1661_v59 }
 0xfa5   :  { %v1667_v4 = vsel %vm193_vm2, %v1663_v3, 0.0 }
 0xfa6   :  { %1668 = vadd.xlane.f32.xlu2 %v1667_v4 }
0x1011   :  { %v1666_v6 = vpop.xlane.xlu2 %1665 }
0x1012   :  { %v1670_v7 = vmul.f32 %v1666_v6, %v2370_v36 }
0x1014   :  { %v1672_v8 = vadd.f32 1e-05, %v1670_v7 }
0x1016   :  { %2203 = vrsqrt.f32 %v1672_v8  ;;  %vm1680_vm13 = vweird.f32 %v1672_v8 }
0x1019   :  { %v1669_v10 = vpop.xlane.xlu2 %1668 }
0x101a   :  { %v1671_v11 = vmul.f32 %v1669_v10, %v2370_v36  ;;  %v2117_v36 = vld [vmem:[%s2822_s9 + $0x1] ss:$0 sm:$0xff] }
0x101c   :  { %v2204_v12 = vpop.eup %2203  ;;  %v1673_v14 = vadd.f32 1e-05, %v1671_v11 }
0x101d   :  { %v1675_v15 = vmul.f32 %v2204_v12, %v1672_v8  ;;  %vm1681_vm10 = vweird.f32 %v2204_v12 }
0x101e   :  { %2205 = vrsqrt.f32 %v1673_v14  ;;  %vm1682_vm14 = vmor %vm1680_vm13, %vm1681_vm10  ;;  %vm1690_vm3 = vweird.f32 %v1673_v14 }
0x101f   :  { %v1676_v16 = vmul.f32 %v2204_v12, %v1675_v15 }
0x1021   :  { %v1677_v18 = vmul.f32 0.5, %v1676_v16 }
0x1023   :  { %v1678_v19 = vsub.f32 1.5, %v1677_v18 }
0x1024   :  { %v2206_v20 = vpop.eup %2205 }
0x1025   :  { %v1679_v32 = vmul.f32 %v2204_v12, %v1678_v19  ;;  %v1685_v23 = vmul.f32 %v2206_v20, %v1673_v14  ;;  %vm1691_vm15 = vweird.f32 %v2206_v20 }
0x1026   :  { %vm1692_vm4 = vmor %vm1690_vm3, %vm1691_vm15 }
0x1027   :  { %v1686_v21 = vmul.f32 %v2206_v20, %v1685_v23  ;;  %v1683_v24 = vsel %vm1682_vm14, %v2204_v12, %v1679_v32 }
0x1028   :  { %v1694_v29 = vmul.f32 %v1683_v24, %v1660_v55 }
0x1029   :  { %v1687_v25 = vmul.f32 0.5, %v1686_v21 }
0x102a   :  { %v1699_v34 = vmul.f32 %v2117_v36, %v1694_v29 }
0x102b   :  { %v1688_v27 = vsub.f32 1.5, %v1687_v25 }
0x102c   :  { %v1704_v38 = vadd.f32 %v2118_v33, %v1699_v34 }
0x102d   :  { %v1689_v30 = vmul.f32 %v2206_v20, %v1688_v27 }
0x102f   :  { %v1693_v31 = vsel %vm1692_vm4, %v2206_v20, %v1689_v30 }
0x1030   :  { %v1695_v35 = vmul.f32 %v1693_v31, %v1661_v59  ;;  %v2120_v59 = vld [vmem:[%s2826_s14 + $0x1] ss:$0 sm:$0xff] }
0x1032   :  { %v1700_v37 = vmul.f32 %v2117_v36, %v1695_v35 }
0x1034   :  { %v1705_v39 = vadd.f32 %v2118_v33, %v1700_v37 }
0x1036   :  { %v1706_v13 = vpack.c.bf16 %v1705_v39, %v1704_v38 }
0x1038   :  { %2000 = vmatmul.msk.bf16.vlgmr.msra.gmra.mxu3 %vm189_vm1, %v1706_v13 }
0x10bb   :  { %v1741_v26 = vpop.f32.mrf.mxu3 }
0x10bc   :  { %v1742_v51 = vadd.f32 %v2119_v45, %v1741_v26 }
0x10be   :  { %v1746_v47 = vmul.f32 %v1742_v51, %v1742_v51 }
0x10c0   :  { %v1748_v48 = vmul.f32 %v1746_v47, %v1742_v51 }
0x10c2   :  { %v1750_v49 = vmul.f32 0.044715, %v1748_v48 }
0x10c3   :  { %v1743_v50 = vpop.f32.mrf.mxu3 }
0x10c4   :  { %v1752_v28 = vadd.f32 %v1750_v49, %v1742_v51  ;;  %v1744_v52 = vadd.f32 %v2119_v45, %v1743_v50 }
0x10c6   :  { %v1754_v53 = vmul.f32 0.7978846, %v1752_v28  ;;  %v1747_v54 = vmul.f32 %v1744_v52, %v1744_v52 }
0x10c8   :  { %v1749_v46 = vmul.f32 %v1747_v54, %v1744_v52  ;;  %2207 = vtanh.f32 %v1754_v53 }
0x10ca   :  { %v1751_v56 = vmul.f32 0.044715, %v1749_v46 }
0x10cc   :  { %v1753_v58 = vadd.f32 %v1751_v56, %v1744_v52 }
0x10ce   :  { %v1755_v60 = vmul.f32 0.7978846, %v1753_v58  ;;  %v2208_v61 = vpop.eup %2207 }
0x10cf   :  { %v1758_v40 = vadd.f32 1.0, %v2208_v61 }
0x10d0   :  { %2209 = vtanh.f32 %v1755_v60 }
0x10d1   :  { %v1760_v63 = vmul.f32 0.5, %v1758_v40 }
0x10d3   :  { %v1762_v1 = vmul.f32 %v1760_v63, %v1742_v51 }
0x10d6   :  { %v2210_v17 = vpop.eup %2209 }
0x10d7   :  { %v1759_v55 = vadd.f32 1.0, %v2210_v17 }
0x10d9   :  { %v1761_v0 = vmul.f32 0.5, %v1759_v55 }
0x10db   :  { %v1763_v44 = vmul.f32 %v1761_v0, %v1744_v52 }
0x10dd   :  { %v1764_v2 = vpack.c.bf16 %v1763_v44, %v1762_v1 }
0x10df   :  { %2025 = vmatmul.msk.bf16.vlgmr.msrb.gmra.mxu0 %vm155_vm0, %v1764_v2 }
0x115c   :  { %v1810_v3 = vpop.f32.mrf.mxu0 }
0x115d   :  { %v1815_v4 = vadd.f32 %v1810_v3, %v2754_v57 }
0x115f   :  { %v1822_v5 = vadd.f32 %v2120_v59, %v1815_v4 }
0x1161   :  { %1824 = vst.msk [vmem:[%s2828_s15] sm:$0xff] %vm189_vm1, %v1822_v5 }
0x1164   :  { %v1812_v6 = vpop.f32.mrf.mxu0 }
0x1165   :  { %v1816_v7 = vadd.f32 %v1812_v6, %v2759_v62 }
0x1167   :  { %v1823_v8 = vadd.f32 %v2120_v59, %v1816_v7 }
0x1169   :  { %1825 = vst.msk [vmem:[%s2828_s15 + $0x8] sm:$0x3] %vm193_vm2, %v1823_v8 }

</bundles_post_ra>
